<compile_context>
chip_gen: v6e
topology: v6e:2x2x1
jax: 0.10.0
libtpu: 0.0.40
codegen_flags: <defaults>
</compile_context>

<pallas_src>
import jax
import jax.numpy as jnp
from jax import lax
from jax.experimental import pallas as pl
from jax.experimental.pallas import tpu as pltpu


_C_TOTAL = 10   # 3 CE columns + 7 BCE columns
_C_CE = 3
_C_BCE = _C_TOTAL - _C_CE
_NUM_CORES = 2  # v7x megacore split; harmless (sequential) on 1-TC chips


def _round_up(x, m):
    return (x + m - 1) // m * m


def _tile_loss_sums(p, y, row_valid):
    """CE / BCE partial sums for one (tile_m, 10) tile.

    p, y: f32 (tile_m, 10). row_valid: bool (tile_m, 1) or None (full tile).
    Returns (ce_sum, bce_sum) scalars.
    """
    col = lax.broadcasted_iota(jnp.int32, (1, _C_TOTAL), 1)
    ce_cols = col < _C_CE            # (1, 10): columns 0..2
    bce_cols = col >= _C_CE          # (1, 10): columns 3..9

    if row_valid is not None:
        # Zero invalid rows BEFORE any transcendental so inf/NaN garbage in
        # out-of-bounds block padding cannot poison the accumulators.
        p = jnp.where(row_valid, p, 0.0)
        y = jnp.where(row_valid, y, 0.0)

    # ---- 3-class cross-entropy over columns 0..2 (lane reductions) ----
    p_ce = jnp.where(ce_cols, p, -1e30)                        # (tile_m, 10)
    m = jnp.max(p_ce, axis=1, keepdims=True)                   # (tile_m, 1)
    lse = jnp.log(jnp.sum(jnp.exp(p_ce - m), axis=1, keepdims=True)) + m
    y_ce = jnp.where(ce_cols, y, 0.0)
    pos_sum = jnp.sum(y_ce, axis=1, keepdims=True)              # (tile_m, 1)
    # One-hot pick of the target logit (assumes one-hot first-3 labels, like
    # the PyTorch module); all-zero rows are remapped to class 1.
    picked = jnp.sum(y_ce * p, axis=1, keepdims=True)
    picked = jnp.where(pos_sum == 0.0, p[:, 1:2], picked)
    ce_row = lse - picked                                        # (tile_m, 1)

    # ---- BCE-with-logits over columns 3..9 ----
    # log1p written as log(1+x) to stay on ops with guaranteed Mosaic lowering.
    bce = jnp.maximum(p, 0.0) - p * y + jnp.log(1.0 + jnp.exp(-jnp.abs(p)))
    bce = jnp.where(bce_cols, bce, 0.0)

    if row_valid is not None:
        ce_row = jnp.where(row_valid, ce_row, 0.0)
        bce = jnp.where(row_valid, bce, 0.0)

    return jnp.sum(ce_row), jnp.sum(bce)


def _make_kernel(n, tile_m, tiles_per_core):
    # Python floats/ints only — nothing here may be a jnp array (captured
    # constants are rejected by pallas_call tracing).
    inv_n_ce = 1.0 / float(n)
    inv_n_bce = 1.0 / (float(n) * float(_C_BCE))

    def kernel(pred_ref, label_ref, out_ref, acc_ce, acc_bce):
        core = pl.program_id(0)
        i = pl.program_id(1)

        @pl.when(i == 0)
        def _init():
            acc_ce[...] = jnp.zeros_like(acc_ce)
            acc_bce[...] = jnp.zeros_like(acc_bce)

        # Intended (unclamped) row tile of this grid point. The index_map
        # clamps the DMA to the last in-range block; the row mask below zeroes
        # any rows that are past the end of the batch (partial or dead tile).
        row_off = (core * tiles_per_core + i) * tile_m
        is_full = row_off + tile_m <= n

        p = pred_ref[...].astype(jnp.float32)
        y = label_ref[...].astype(jnp.float32)

        @pl.when(is_full)
        def _fast():  # unmasked fast path — every tile except the last partial one
            ce_s, bce_s = _tile_loss_sums(p, y, None)
            acc_ce[...] = acc_ce[...] + ce_s
            acc_bce[...] = acc_bce[...] + bce_s

        @pl.when(jnp.logical_not(is_full))
        def _masked():  # partial / clamped-dead tile only
            rows = lax.broadcasted_iota(jnp.int32, (tile_m, 1), 0) + row_off
            ce_s, bce_s = _tile_loss_sums(p, y, rows < n)
            acc_ce[...] = acc_ce[...] + ce_s
            acc_bce[...] = acc_bce[...] + bce_s

        @pl.when(i == pl.num_programs(1) - 1)
        def _finalize():
            part = acc_ce[...] * inv_n_ce + acc_bce[...] * inv_n_bce  # (1, 1)
            out_ref[...] = jnp.broadcast_to(part, out_ref.shape)

    return kernel


def normal_rsna_loss(pred, label, *, tile_m=None, min_pallas_rows=8192):
    """pred, label: (N, 10). Returns scalar f32 loss = CE(first 3) + BCE(last 7).

    pred/label may be any float dtype (bf16/f32); upcast happens in-kernel.
    """
    n, c = pred.shape
    assert c == _C_TOTAL, f"expected {_C_TOTAL} columns, got {c}"
    assert label.shape == (n, c)

    if n < min_pallas_rows:
        # Review item 7: for small N the fixed launch overhead dominates and
        # fused XLA wins outright.
        return normal_rsna_loss_ref(pred, label)

    if tile_m is None:
        # 4096 rows: 2 inputs x 2 pipeline buffers x 4096 x 128 (lane-padded)
        # x 4B = 8 MiB VMEM — inside v5e's 16 MiB scoped-VMEM default.
        tile_m = min(4096, _round_up(n, 8))
    assert tile_m % 8 == 0 or tile_m == n

    total_tiles = -(-n // tile_m)
    tiles_per_core = -(-total_tiles // _NUM_CORES)
    last_tile = total_tiles - 1

    def row_block(core, i):
        # Clamp so no DMA reads a fully out-of-range block; dead repeats are
        # zeroed by the in-kernel row mask.
        return jnp.minimum(core * tiles_per_core + i, last_tile)

    in_spec = pl.BlockSpec((tile_m, c), lambda core, i: (row_block(core, i), 0))

    cost = pl.CostEstimate(
        flops=100 * n,
        transcendentals=18 * n,
        bytes_accessed=n * c * (pred.dtype.itemsize + label.dtype.itemsize),
    )

    out = pl.pallas_call(
        _make_kernel(n, tile_m, tiles_per_core),
        out_shape=jax.ShapeDtypeStruct((_NUM_CORES * 8, 128), jnp.float32),
        grid_spec=pltpu.PrefetchScalarGridSpec(
            num_scalar_prefetch=0,
            grid=(_NUM_CORES, tiles_per_core),
            in_specs=[in_spec, in_spec],
            out_specs=pl.BlockSpec((8, 128), lambda core, i: (core, 0)),
            scratch_shapes=[
                pltpu.VMEM((1, 1), jnp.float32),   # CE sum accumulator
                pltpu.VMEM((1, 1), jnp.float32),   # BCE sum accumulator
            ],
        ),
        compiler_params=pltpu.CompilerParams(
            dimension_semantics=("parallel", "arbitrary"),
        ),
        cost_estimate=cost,
    )(pred, label)

    # Per-core partial losses sit at rows 0, 8, ...; add them up.
    return jnp.sum(out[0::8, 0])


def normal_rsna_loss_ref(pred, label):
    """Pure-JAX reference mirroring the PyTorch forward (float32)."""
    pred = pred.astype(jnp.float32)
    label = label.astype(jnp.float32)

    p3 = pred[:, :_C_CE]
    y3 = label[:, :_C_CE]
    no_pos = jnp.sum(y3, axis=1) == 0.0
    tgt = jnp.where(no_pos, 1, jnp.argmax(y3, axis=1))
    m = jnp.max(p3, axis=1, keepdims=True)
    lse = jnp.log(jnp.sum(jnp.exp(p3 - m), axis=1, keepdims=True)) + m
    picked = jnp.take_along_axis(p3, tgt[:, None], axis=1)
    ce = jnp.mean(lse[:, 0] - picked[:, 0])

    x = pred[:, _C_CE:]
    t = label[:, _C_CE:]
    bce = jnp.mean(jnp.maximum(x, 0.0) - x * t + jnp.log1p(jnp.exp(-jnp.abs(x))))
    return ce + bce


if __name__ == "__main__":
    key = jax.random.PRNGKey(0)
    k1, k2, k3 = jax.random.split(key, 3)

    N = 250
    pred = jax.random.normal(k1, (N, _C_TOTAL), dtype=jnp.float32)

    # First-3 labels: one-hot classes 0..2, plus some all-zero rows (cls==3)
    # to exercise the "remap to [0,1,0]" path. Last-7 labels: random {0,1}.
    cls = jax.random.randint(k2, (N,), 0, 4)
    label3 = (cls[:, None] == jnp.arange(3)[None, :]).astype(jnp.float32)
    label7 = jax.random.bernoulli(k3, 0.3, (N, _C_BCE)).astype(jnp.float32)
    label = jnp.concatenate([label3, label7], axis=1)

    # tile_m=64 -> 4 row tiles over a (2, 2) grid: exercises the parallel
    # split, init/accumulate/finalize, and the masked partial-tile path
    # (250 % 64 != 0). min_pallas_rows=0 forces the Pallas path for the demo.
    out = normal_rsna_loss(pred, label, tile_m=64, min_pallas_rows=0)
    out = jax.block_until_ready(out)

    ref = jax.block_until_ready(normal_rsna_loss_ref(pred, label))
    assert jnp.allclose(out, ref, rtol=1e-4, atol=1e-4), (out, ref)

    print("KERNEL_OK")
</pallas_src>

<mosaic_0001>
module attributes {stable_mosaic.version = 11 : i64} {
  func.func @kernel(%arg0: i32, %arg1: i32, %arg2: memref<64x10xf32, #tpu.memory_space<vmem>>, %arg3: memref<64x10xf32, #tpu.memory_space<vmem>>, %arg4: memref<8x128xf32, #tpu.memory_space<vmem>>, %arg5: memref<1x1xf32, #tpu.memory_space<vmem>>, %arg6: memref<1x1xf32, #tpu.memory_space<vmem>>) attributes {dimension_semantics = [#tpu.dimension_semantics<parallel>, #tpu.dimension_semantics<arbitrary>], iteration_bounds = array<i64: 2, 2>, scalar_prefetch = 0 : i64, scratch_operands = 2 : i64, tpu.core_type = #tpu.core_type<tc>, window_params = [{transform_indices = @transform_0, window_bounds = array<i64: 64, 10>}, {transform_indices = @transform_1, window_bounds = array<i64: 64, 10>}, {transform_indices = @transform_2, window_bounds = array<i64: 8, 128>}]} {
    %c0_i32 = arith.constant 0 : i32
    %0 = arith.cmpi eq, %arg1, %c0_i32 : i32
    %1 = arith.extui %0 : i1 to i32
    %c0_i32_0 = arith.constant 0 : i32
    %2 = arith.cmpi ne, %1, %c0_i32_0 : i32
    scf.if %2 {
      %cst = arith.constant 0.000000e+00 : f32
      %18 = vector.broadcast %cst : f32 to vector<1x1xf32>
      %c0_8 = arith.constant 0 : index
      %c0_9 = arith.constant 0 : index
      %19 = vector.load %arg5[%c0_8, %c0_9] : memref<1x1xf32, #tpu.memory_space<vmem>>, vector<1x1xf32>
      tpu.vector_store %arg5[%c0_8, %c0_9], %18 {strides = array<i32>} : memref<1x1xf32, #tpu.memory_space<vmem>>, vector<1x1xf32>,
      %cst_10 = arith.constant 0.000000e+00 : f32
      %20 = vector.broadcast %cst_10 : f32 to vector<1x1xf32>
      %c0_11 = arith.constant 0 : index
      %c0_12 = arith.constant 0 : index
      %21 = vector.load %arg6[%c0_11, %c0_12] : memref<1x1xf32, #tpu.memory_space<vmem>>, vector<1x1xf32>
      tpu.vector_store %arg6[%c0_11, %c0_12], %20 {strides = array<i32>} : memref<1x1xf32, #tpu.memory_space<vmem>>, vector<1x1xf32>,
    } else {
    }
    %c2_i32 = arith.constant 2 : i32
    %3 = arith.muli %arg0, %c2_i32 : i32
    %4 = arith.addi %3, %arg1 : i32
    %c64_i32 = arith.constant 64 : i32
    %5 = arith.muli %4, %c64_i32 : i32
    %c64_i32_1 = arith.constant 64 : i32
    %6 = arith.addi %5, %c64_i32_1 : i32
    %c250_i32 = arith.constant 250 : i32
    %7 = arith.cmpi sle, %6, %c250_i32 : i32
    %c0 = arith.constant 0 : index
    %c0_2 = arith.constant 0 : index
    %8 = vector.load %arg2[%c0, %c0_2] : memref<64x10xf32, #tpu.memory_space<vmem>>, vector<64x10xf32>
    %c0_3 = arith.constant 0 : index
    %c0_4 = arith.constant 0 : index
    %9 = vector.load %arg3[%c0_3, %c0_4] : memref<64x10xf32, #tpu.memory_space<vmem>>, vector<64x10xf32>
    %10 = arith.extui %7 : i1 to i32
    %c0_i32_5 = arith.constant 0 : i32
    %11 = arith.cmpi ne, %10, %c0_i32_5 : i32
    scf.if %11 {
      %18 = tpu.iota {dimensions = array<i32: 1>} : vector<1x10xi32>
      %c3_i32 = arith.constant 3 : i32
      %19 = vector.broadcast %c3_i32 : i32 to vector<1x10xi32>
      %20 = arith.cmpi slt, %18, %19 : vector<1x10xi32>
      %c3_i32_8 = arith.constant 3 : i32
      %21 = vector.broadcast %c3_i32_8 : i32 to vector<1x10xi32>
      %22 = arith.cmpi sge, %18, %21 : vector<1x10xi32>
      %cst = arith.constant -1.000000e+30 : f32
      %23 = vector.shape_cast %20 : vector<1x10xi1> to vector<1x10xi1>
      %24 = vector.broadcast %23 : vector<1x10xi1> to vector<64x10xi1>
      %25 = vector.broadcast %cst : f32 to vector<64x10xf32>
      %26 = arith.select %24, %8, %25 : vector<64x10xi1>, vector<64x10xf32>
      %cst_9 = arith.constant dense<0xFF800000> : vector<64xf32>
      %27 = vector.multi_reduction <maximumf>, %26, %cst_9 [1] : vector<64x10xf32> to vector<64xf32>
      %28 = vector.shape_cast %27 : vector<64xf32> to vector<64x1xf32>
      %29 = vector.broadcast %28 : vector<64x1xf32> to vector<64x10xf32>
      %30 = arith.subf %26, %29 : vector<64x10xf32>
      %31 = math.exp %30 : vector<64x10xf32>
      %cst_10 = arith.constant dense<0.000000e+00> : vector<64xf32>
      %32 = vector.multi_reduction <add>, %31, %cst_10 [1] : vector<64x10xf32> to vector<64xf32>
      %33 = vector.shape_cast %32 : vector<64xf32> to vector<64x1xf32>
      %34 = math.log %33 : vector<64x1xf32>
      %35 = arith.addf %34, %28 : vector<64x1xf32>
      %cst_11 = arith.constant 0.000000e+00 : f32
      %36 = vector.shape_cast %20 : vector<1x10xi1> to vector<1x10xi1>
      %37 = vector.broadcast %36 : vector<1x10xi1> to vector<64x10xi1>
      %38 = vector.broadcast %cst_11 : f32 to vector<64x10xf32>
      %39 = arith.select %37, %9, %38 : vector<64x10xi1>, vector<64x10xf32>
      %cst_12 = arith.constant dense<0.000000e+00> : vector<64xf32>
      %40 = vector.multi_reduction <add>, %39, %cst_12 [1] : vector<64x10xf32> to vector<64xf32>
      %41 = vector.shape_cast %40 : vector<64xf32> to vector<64x1xf32>
      %42 = arith.mulf %39, %8 : vector<64x10xf32>
      %cst_13 = arith.constant dense<0.000000e+00> : vector<64xf32>
      %43 = vector.multi_reduction <add>, %42, %cst_13 [1] : vector<64x10xf32> to vector<64xf32>
      %44 = vector.shape_cast %43 : vector<64xf32> to vector<64x1xf32>
      %cst_14 = arith.constant 0.000000e+00 : f32
      %45 = vector.broadcast %cst_14 : f32 to vector<64x1xf32>
      %46 = arith.cmpf oeq, %41, %45 : vector<64x1xf32>
      %47 = vector.extract_strided_slice %8 {offsets = [0, 1], sizes = [64, 1], strides = [1, 1]} : vector<64x10xf32> to vector<64x1xf32>
      %48 = arith.select %46, %47, %44 : vector<64x1xi1>, vector<64x1xf32>
      %49 = arith.subf %35, %48 : vector<64x1xf32>
      %cst_15 = arith.constant 0.000000e+00 : f32
      %50 = vector.broadcast %cst_15 : f32 to vector<64x10xf32>
      %51 = arith.maximumf %8, %50 : vector<64x10xf32>
      %52 = arith.mulf %8, %9 : vector<64x10xf32>
      %53 = arith.subf %51, %52 : vector<64x10xf32>
      %54 = math.absf %8 : vector<64x10xf32>
      %cst_16 = arith.constant 0.000000e+00 : f32
      %55 = vector.broadcast %cst_16 : f32 to vector<64x10xf32>
      %56 = arith.subf %55, %54 : vector<64x10xf32>
      %57 = math.exp %56 : vector<64x10xf32>
      %cst_17 = arith.constant 1.000000e+00 : f32
      %58 = vector.broadcast %cst_17 : f32 to vector<64x10xf32>
      %59 = arith.addf %58, %57 : vector<64x10xf32>
      %60 = math.log %59 : vector<64x10xf32>
      %61 = arith.addf %53, %60 : vector<64x10xf32>
      %cst_18 = arith.constant 0.000000e+00 : f32
      %62 = vector.shape_cast %22 : vector<1x10xi1> to vector<1x10xi1>
      %63 = vector.broadcast %62 : vector<1x10xi1> to vector<64x10xi1>
      %64 = vector.broadcast %cst_18 : f32 to vector<64x10xf32>
      %65 = arith.select %63, %61, %64 : vector<64x10xi1>, vector<64x10xf32>
      %66 = vector.shape_cast %49 : vector<64x1xf32> to vector<1x64x1xf32>
      %cst_19 = arith.constant dense<0.000000e+00> : vector<1xf32>
      %67 = vector.multi_reduction <add>, %66, %cst_19 [1, 2] : vector<1x64x1xf32> to vector<1xf32>
      %68 = vector.shape_cast %67 : vector<1xf32> to vector<1x1x1xf32>
      %69 = vector.extract %68[0, 0, 0] : f32 from vector<1x1x1xf32>
      %70 = vector.shape_cast %65 : vector<64x10xf32> to vector<1x64x10xf32>
      %cst_20 = arith.constant dense<0.000000e+00> : vector<1xf32>
      %71 = vector.multi_reduction <add>, %70, %cst_20 [1, 2] : vector<1x64x10xf32> to vector<1xf32>
      %72 = vector.shape_cast %71 : vector<1xf32> to vector<1x1x1xf32>
      %73 = vector.extract %72[0, 0, 0] : f32 from vector<1x1x1xf32>
      %c0_21 = arith.constant 0 : index
      %c0_22 = arith.constant 0 : index
      %74 = vector.load %arg5[%c0_21, %c0_22] : memref<1x1xf32, #tpu.memory_space<vmem>>, vector<1x1xf32>
      %75 = vector.broadcast %69 : f32 to vector<1x1xf32>
      %76 = arith.addf %74, %75 : vector<1x1xf32>
      %c0_23 = arith.constant 0 : index
      %c0_24 = arith.constant 0 : index
      %77 = vector.load %arg5[%c0_23, %c0_24] : memref<1x1xf32, #tpu.memory_space<vmem>>, vector<1x1xf32>
      tpu.vector_store %arg5[%c0_23, %c0_24], %76 {strides = array<i32>} : memref<1x1xf32, #tpu.memory_space<vmem>>, vector<1x1xf32>,
      %c0_25 = arith.constant 0 : index
      %c0_26 = arith.constant 0 : index
      %78 = vector.load %arg6[%c0_25, %c0_26] : memref<1x1xf32, #tpu.memory_space<vmem>>, vector<1x1xf32>
      %79 = vector.broadcast %73 : f32 to vector<1x1xf32>
      %80 = arith.addf %78, %79 : vector<1x1xf32>
      %c0_27 = arith.constant 0 : index
      %c0_28 = arith.constant 0 : index
      %81 = vector.load %arg6[%c0_27, %c0_28] : memref<1x1xf32, #tpu.memory_space<vmem>>, vector<1x1xf32>
      tpu.vector_store %arg6[%c0_27, %c0_28], %80 {strides = array<i32>} : memref<1x1xf32, #tpu.memory_space<vmem>>, vector<1x1xf32>,
    } else {
    }
    %true = arith.constant true
    %12 = arith.xori %7, %true : i1
    %13 = arith.extui %12 : i1 to i32
    %c0_i32_6 = arith.constant 0 : i32
    %14 = arith.cmpi ne, %13, %c0_i32_6 : i32
    scf.if %14 {
      %18 = tpu.iota {dimensions = array<i32: 0>} : vector<64x1xi32>
      %19 = vector.broadcast %5 : i32 to vector<64x1xi32>
      %20 = arith.addi %18, %19 : vector<64x1xi32>
      %c250_i32_8 = arith.constant 250 : i32
      %21 = vector.broadcast %c250_i32_8 : i32 to vector<64x1xi32>
      %22 = arith.cmpi slt, %20, %21 : vector<64x1xi32>
      %23 = tpu.iota {dimensions = array<i32: 1>} : vector<1x10xi32>
      %c3_i32 = arith.constant 3 : i32
      %24 = vector.broadcast %c3_i32 : i32 to vector<1x10xi32>
      %25 = arith.cmpi slt, %23, %24 : vector<1x10xi32>
      %c3_i32_9 = arith.constant 3 : i32
      %26 = vector.broadcast %c3_i32_9 : i32 to vector<1x10xi32>
      %27 = arith.cmpi sge, %23, %26 : vector<1x10xi32>
      %cst = arith.constant 0.000000e+00 : f32
      %28 = vector.shape_cast %22 : vector<64x1xi1> to vector<64x1xi1>
      %29 = vector.broadcast %28 : vector<64x1xi1> to vector<64x10xi1>
      %30 = vector.broadcast %cst : f32 to vector<64x10xf32>
      %31 = arith.select %29, %8, %30 : vector<64x10xi1>, vector<64x10xf32>
      %cst_10 = arith.constant 0.000000e+00 : f32
      %32 = vector.shape_cast %22 : vector<64x1xi1> to vector<64x1xi1>
      %33 = vector.broadcast %32 : vector<64x1xi1> to vector<64x10xi1>
      %34 = vector.broadcast %cst_10 : f32 to vector<64x10xf32>
      %35 = arith.select %33, %9, %34 : vector<64x10xi1>, vector<64x10xf32>
      %cst_11 = arith.constant -1.000000e+30 : f32
      %36 = vector.shape_cast %25 : vector<1x10xi1> to vector<1x10xi1>
      %37 = vector.broadcast %36 : vector<1x10xi1> to vector<64x10xi1>
      %38 = vector.broadcast %cst_11 : f32 to vector<64x10xf32>
      %39 = arith.select %37, %31, %38 : vector<64x10xi1>, vector<64x10xf32>
      %cst_12 = arith.constant dense<0xFF800000> : vector<64xf32>
      %40 = vector.multi_reduction <maximumf>, %39, %cst_12 [1] : vector<64x10xf32> to vector<64xf32>
      %41 = vector.shape_cast %40 : vector<64xf32> to vector<64x1xf32>
      %42 = vector.broadcast %41 : vector<64x1xf32> to vector<64x10xf32>
      %43 = arith.subf %39, %42 : vector<64x10xf32>
      %44 = math.exp %43 : vector<64x10xf32>
      %cst_13 = arith.constant dense<0.000000e+00> : vector<64xf32>
      %45 = vector.multi_reduction <add>, %44, %cst_13 [1] : vector<64x10xf32> to vector<64xf32>
      %46 = vector.shape_cast %45 : vector<64xf32> to vector<64x1xf32>
      %47 = math.log %46 : vector<64x1xf32>
      %48 = arith.addf %47, %41 : vector<64x1xf32>
      %cst_14 = arith.constant 0.000000e+00 : f32
      %49 = vector.shape_cast %25 : vector<1x10xi1> to vector<1x10xi1>
      %50 = vector.broadcast %49 : vector<1x10xi1> to vector<64x10xi1>
      %51 = vector.broadcast %cst_14 : f32 to vector<64x10xf32>
      %52 = arith.select %50, %35, %51 : vector<64x10xi1>, vector<64x10xf32>
      %cst_15 = arith.constant dense<0.000000e+00> : vector<64xf32>
      %53 = vector.multi_reduction <add>, %52, %cst_15 [1] : vector<64x10xf32> to vector<64xf32>
      %54 = vector.shape_cast %53 : vector<64xf32> to vector<64x1xf32>
      %55 = arith.mulf %52, %31 : vector<64x10xf32>
      %cst_16 = arith.constant dense<0.000000e+00> : vector<64xf32>
      %56 = vector.multi_reduction <add>, %55, %cst_16 [1] : vector<64x10xf32> to vector<64xf32>
      %57 = vector.shape_cast %56 : vector<64xf32> to vector<64x1xf32>
      %cst_17 = arith.constant 0.000000e+00 : f32
      %58 = vector.broadcast %cst_17 : f32 to vector<64x1xf32>
      %59 = arith.cmpf oeq, %54, %58 : vector<64x1xf32>
      %60 = vector.extract_strided_slice %31 {offsets = [0, 1], sizes = [64, 1], strides = [1, 1]} : vector<64x10xf32> to vector<64x1xf32>
      %61 = arith.select %59, %60, %57 : vector<64x1xi1>, vector<64x1xf32>
      %62 = arith.subf %48, %61 : vector<64x1xf32>
      %cst_18 = arith.constant 0.000000e+00 : f32
      %63 = vector.broadcast %cst_18 : f32 to vector<64x10xf32>
      %64 = arith.maximumf %31, %63 : vector<64x10xf32>
      %65 = arith.mulf %31, %35 : vector<64x10xf32>
      %66 = arith.subf %64, %65 : vector<64x10xf32>
      %67 = math.absf %31 : vector<64x10xf32>
      %cst_19 = arith.constant 0.000000e+00 : f32
      %68 = vector.broadcast %cst_19 : f32 to vector<64x10xf32>
      %69 = arith.subf %68, %67 : vector<64x10xf32>
      %70 = math.exp %69 : vector<64x10xf32>
      %cst_20 = arith.constant 1.000000e+00 : f32
      %71 = vector.broadcast %cst_20 : f32 to vector<64x10xf32>
      %72 = arith.addf %71, %70 : vector<64x10xf32>
      %73 = math.log %72 : vector<64x10xf32>
      %74 = arith.addf %66, %73 : vector<64x10xf32>
      %cst_21 = arith.constant 0.000000e+00 : f32
      %75 = vector.shape_cast %27 : vector<1x10xi1> to vector<1x10xi1>
      %76 = vector.broadcast %75 : vector<1x10xi1> to vector<64x10xi1>
      %77 = vector.broadcast %cst_21 : f32 to vector<64x10xf32>
      %78 = arith.select %76, %74, %77 : vector<64x10xi1>, vector<64x10xf32>
      %cst_22 = arith.constant 0.000000e+00 : f32
      %79 = vector.broadcast %cst_22 : f32 to vector<64x1xf32>
      %80 = arith.select %22, %62, %79 : vector<64x1xi1>, vector<64x1xf32>
      %cst_23 = arith.constant 0.000000e+00 : f32
      %81 = vector.shape_cast %22 : vector<64x1xi1> to vector<64x1xi1>
      %82 = vector.broadcast %81 : vector<64x1xi1> to vector<64x10xi1>
      %83 = vector.broadcast %cst_23 : f32 to vector<64x10xf32>
      %84 = arith.select %82, %78, %83 : vector<64x10xi1>, vector<64x10xf32>
      %85 = vector.shape_cast %80 : vector<64x1xf32> to vector<1x64x1xf32>
      %cst_24 = arith.constant dense<0.000000e+00> : vector<1xf32>
      %86 = vector.multi_reduction <add>, %85, %cst_24 [1, 2] : vector<1x64x1xf32> to vector<1xf32>
      %87 = vector.shape_cast %86 : vector<1xf32> to vector<1x1x1xf32>
      %88 = vector.extract %87[0, 0, 0] : f32 from vector<1x1x1xf32>
      %89 = vector.shape_cast %84 : vector<64x10xf32> to vector<1x64x10xf32>
      %cst_25 = arith.constant dense<0.000000e+00> : vector<1xf32>
      %90 = vector.multi_reduction <add>, %89, %cst_25 [1, 2] : vector<1x64x10xf32> to vector<1xf32>
      %91 = vector.shape_cast %90 : vector<1xf32> to vector<1x1x1xf32>
      %92 = vector.extract %91[0, 0, 0] : f32 from vector<1x1x1xf32>
      %c0_26 = arith.constant 0 : index
      %c0_27 = arith.constant 0 : index
      %93 = vector.load %arg5[%c0_26, %c0_27] : memref<1x1xf32, #tpu.memory_space<vmem>>, vector<1x1xf32>
      %94 = vector.broadcast %88 : f32 to vector<1x1xf32>
      %95 = arith.addf %93, %94 : vector<1x1xf32>
      %c0_28 = arith.constant 0 : index
      %c0_29 = arith.constant 0 : index
      %96 = vector.load %arg5[%c0_28, %c0_29] : memref<1x1xf32, #tpu.memory_space<vmem>>, vector<1x1xf32>
      tpu.vector_store %arg5[%c0_28, %c0_29], %95 {strides = array<i32>} : memref<1x1xf32, #tpu.memory_space<vmem>>, vector<1x1xf32>,
      %c0_30 = arith.constant 0 : index
      %c0_31 = arith.constant 0 : index
      %97 = vector.load %arg6[%c0_30, %c0_31] : memref<1x1xf32, #tpu.memory_space<vmem>>, vector<1x1xf32>
      %98 = vector.broadcast %92 : f32 to vector<1x1xf32>
      %99 = arith.addf %97, %98 : vector<1x1xf32>
      %c0_32 = arith.constant 0 : index
      %c0_33 = arith.constant 0 : index
      %100 = vector.load %arg6[%c0_32, %c0_33] : memref<1x1xf32, #tpu.memory_space<vmem>>, vector<1x1xf32>
      tpu.vector_store %arg6[%c0_32, %c0_33], %99 {strides = array<i32>} : memref<1x1xf32, #tpu.memory_space<vmem>>, vector<1x1xf32>,
    } else {
    }
    %c1_i32 = arith.constant 1 : i32
    %15 = arith.cmpi eq, %arg1, %c1_i32 : i32
    %16 = arith.extui %15 : i1 to i32
    %c0_i32_7 = arith.constant 0 : i32
    %17 = arith.cmpi ne, %16, %c0_i32_7 : i32
    scf.if %17 {
      %c0_8 = arith.constant 0 : index
      %c0_9 = arith.constant 0 : index
      %18 = vector.load %arg5[%c0_8, %c0_9] : memref<1x1xf32, #tpu.memory_space<vmem>>, vector<1x1xf32>
      %cst = arith.constant 4.000000e-03 : f32
      %19 = vector.broadcast %cst : f32 to vector<1x1xf32>
      %20 = arith.mulf %18, %19 : vector<1x1xf32>
      %c0_10 = arith.constant 0 : index
      %c0_11 = arith.constant 0 : index
      %21 = vector.load %arg6[%c0_10, %c0_11] : memref<1x1xf32, #tpu.memory_space<vmem>>, vector<1x1xf32>
      %cst_12 = arith.constant 5.71428565E-4 : f32
      %22 = vector.broadcast %cst_12 : f32 to vector<1x1xf32>
      %23 = arith.mulf %21, %22 : vector<1x1xf32>
      %24 = arith.addf %20, %23 : vector<1x1xf32>
      %25 = vector.shape_cast %24 : vector<1x1xf32> to vector<1x1xf32>
      %26 = vector.broadcast %25 : vector<1x1xf32> to vector<8x128xf32>
      %c0_13 = arith.constant 0 : index
      %c0_14 = arith.constant 0 : index
      %27 = vector.load %arg4[%c0_13, %c0_14] : memref<8x128xf32, #tpu.memory_space<vmem>>, vector<8x128xf32>
      tpu.vector_store %arg4[%c0_13, %c0_14], %26 {strides = array<i32>} : memref<8x128xf32, #tpu.memory_space<vmem>>, vector<8x128xf32>,
    } else {
    }
    return
  }
  func.func @transform_0(%arg0: i32, %arg1: i32) -> (i32, i32) {
    %c2_i32 = arith.constant 2 : i32
    %0 = arith.muli %arg0, %c2_i32 : i32
    %1 = arith.addi %0, %arg1 : i32
    %c3_i32 = arith.constant 3 : i32
    %2 = arith.minsi %1, %c3_i32 : i32
    %c0_i32 = arith.constant 0 : i32
    %c0_i32_0 = arith.constant 0 : i32
    return %2, %c0_i32 : i32, i32
  }
  func.func @transform_1(%arg0: i32, %arg1: i32) -> (i32, i32) {
    %c2_i32 = arith.constant 2 : i32
    %0 = arith.muli %arg0, %c2_i32 : i32
    %1 = arith.addi %0, %arg1 : i32
    %c3_i32 = arith.constant 3 : i32
    %2 = arith.minsi %1, %c3_i32 : i32
    %c0_i32 = arith.constant 0 : i32
    %c0_i32_0 = arith.constant 0 : i32
    return %2, %c0_i32 : i32, i32
  }
  func.func @transform_2(%arg0: i32, %arg1: i32) -> (i32, i32) {
    %c0_i32 = arith.constant 0 : i32
    %c0_i32_0 = arith.constant 0 : i32
    return %arg0, %c0_i32 : i32, i32
  }
}

</mosaic_0001>

<bundles_post_ra>
// kernel: tpu_custom_call.1
= control target key start
LH: loop header
LB: loop body
LE: loop exit
PB: predicated region body
PF: predicated region fallthrough
CT: control target
= control target key end

     0   :  { %7 = vsyncpa [#allocation5], 0  ;;  %s2374_s0 = inlined_call_operand.vmem [shape: f32[250,10], index: 0, kind: input, shape index: {}]   ;;  %s2375_s1 = inlined_call_operand.vmem [shape: f32[250,10], index: 1, kind: input, shape index: {}]   ;;  %s2376_s2 = inlined_call_operand.hbm [shape: f32[16,128], index: 2, kind: output, shape index: {}]  }
   0x1   :  { %9 = vsyncpa [#allocation5 + $0x1], 0  ;;  %s1584_s9 = smov 0   ;;  %s1586_s10 = smov 0  }
   0x2   :  { %s1588_s11 = smov 0   ;;  %s1590_s12 = smov 0  }
   0x3   :  { %s1592_s13 = smov 0   ;;  %s1594_s14 = smov 0  }
   0x4   :  { %s1596_s15 = smov 0   ;;  %s1598_s16 = smov 0  }
   0x5 LB: > { %s1232_s17 = sadd.s32 4294967295, %s1562_s16   ;;  %s1233_s18 = sadd.s32 4294967294, %s1562_s16   ;;  %s1562_s16 = sphi %s1598_s16, %s15_s16   ;;  %s1558_s15 = sphi %s1596_s15, %s2385_s15   ;;  %s1554_s14 = sphi %s1594_s14, %s2384_s14   ;;  %s1550_s13 = sphi %s1592_s13, %s2383_s13   ;;  %s1546_s12 = sphi %s1590_s12, %s2382_s12   ;;  %s1542_s11 = sphi %s1588_s11, %s2381_s11   ;;  %s1538_s10 = sphi %s1586_s10, %s2380_s10   ;;  %s1534_s9 = sphi %s1584_s9, %s2379_s9  }
   0x6   : > { %s24_s19 = sadd.s32 1, %s1554_s14  ;;  %s27_s20 = sadd.s32 1, %s1558_s15 }
   0x7   : > { %p25_p0 = scmp.ge.s32.totalorder %s24_s19, 2  ;;  %p112_p1 = scmp.ne.s32.totalorder %s1542_s11, %s1538_s10 }
   0x8   : > { %p113_p2 = scmp.eq.s32.totalorder %s1232_s17, 3  ;;  %p118_p4 = scmp.ne.s32.totalorder %s1538_s10, %s1534_s9 }
   0x9   : > { %s2387_s19 = smov (%p25_p0, %s24_s19), 0  ;;  %s2389_s20 = smov (!%p25_p0, %s27_s20), %s1558_s15 }
   0xa   : > { %p1633_p3 = por %p113_p2, %p112_p1  ;;  %p29_p5 = scmp.ge.s32.totalorder %s2389_s20, 2 }
   0xb   : > { %p119_p6 = scmp.eq.s32.totalorder %s1233_s18, 3  ;;  %p1240_p7 = scmp.ge.s32.totalorder %s1562_s16, 1 }
   0xc   : > { %p171_p8 = scmp.lt.s32.totalorder %s1562_s16, 5  ;;  %s2391_s20 = smov (%p29_p5, %s2389_s20), 0 }
   0xd   : > { %p1643_p9 = por %p119_p6, %p118_p4  ;;  %s99_s23 = ssub.s32 %s1558_s15, %s2391_s20 }
   0xe   : > { %p172_p10 = pnand %p1240_p7, %p171_p8  ;;  %s102_s24 = sadd.s32 1, %s1542_s11 }
   0xf   : > { %p100_p11 = scmp.eq.s32.totalorder %s99_s23, 0  ;;  %s203_s26 = sand.u32 (!%p172_p10), 1, %s1538_s10  }
  0x10   : > { %175 = sbr.rel (%p172_p10) target bundleno = 1544 (0x608), region = 28  ;;  %s1242_s27 = sshll.u32 (!%p172_p10), %s1550_s13, 1 }
  0x11   : > { %s1651_s25 = scalar_select %p100_p11, %s1542_s11, %s102_s24  }
  0x12   : > { %s1657_s28 = sshll.u32 (!%p172_p10), %s203_s26, 3  ;;  %s1660_s29 = sadd.s32 (!%p172_p10), %s1546_s12, %s1242_s27 }
  0x13   : > { %p208_p12 = scmp.lt.s32.totalorder (!%p172_p10), %s1660_s29, 3  ;;  %s205_s23 = scalar_lea.vmem (!%p172_p10), [#allocation4], %s1657_s28 }
  0x14   : > { %p1248_p0 = scmp.ne.s32.totalorder (!%p172_p10), %s1546_s12, 0 }
  0x15   : > { %s209_s30 = scalar_select %p208_p12, %s1660_s29, 3 }
  0x17   : > { %s1243_s3 = sshll.u32 %s209_s30, 3 }
  0x18   : > { %p211_p13 = scmp.lt.s32.totalorder %s1243_s3, 31  ;;  %237 = sbr.rel (%p1248_p0) target bundleno = 31 (0x1f), region = 32 }
  0x1a   : > { %s2393_s3 = smov (!%p211_p13, %s1243_s3), 31 }
  0x1b   : > { %s1244_s4 = sshll.u32 %s2393_s3, 3 }
  0x1c   : > { %s214_s7 = scalar_lea.vmem %s2374_s0, %s1244_s4  ;;  %s228_s18 = scalar_lea.vmem %s2375_s1, %s1244_s4 }
  0x1d   : > { %vm238_vm0 = vcmask 0   ;;  %v1564_v0 = vmov 0.0  }
  0x1e   : > { %239 = vst.msk [vmem:[#allocation2] sm:$0x1] %vm238_vm0, %v1564_v0  ;;  %240 = vst.msk [vmem:[#allocation3] sm:$0x1] %vm238_vm0, %v1564_v0 }
  0x1f PF: > { %s1250_s24 = sshll.u32 %s1660_s29, 6  ;;  %v1673_v1 = vld [vmem:[%s214_s7] sm:$0xff]  ;;  %v1675_v2 = vld [vmem:[%s214_s7 + $0x8] sm:$0xff]  ;;  %v1677_v3 = vld [vmem:[%s214_s7 + $0x10] sm:$0xff] }
  0x20   : > { %s1681_s27 = sadd.s32 64, %s1250_s24  ;;  %v1683_v4 = vld [vmem:[%s214_s7 + $0x18] sm:$0xff]  ;;  %v1685_v5 = vld [vmem:[%s214_s7 + $0x20] sm:$0xff]  ;;  %v1687_v6 = vld [vmem:[%s214_s7 + $0x28] sm:$0xff] }
  0x21   : > { %v1689_v7 = vld [vmem:[%s214_s7 + $0x30] sm:$0xff]  ;;  %v1691_v8 = vld [vmem:[%s214_s7 + $0x38] sm:$0xff]  ;;  %v1693_v9 = vld [vmem:[%s228_s18] sm:$0xff]  ;;  %p1251_p1 = scmp.gt.s32.totalorder %s1681_s27, 250 }
  0x22   : > { %v1695_v10 = vld [vmem:[%s228_s18 + $0x8] sm:$0xff]  ;;  %v1697_v11 = vld [vmem:[%s228_s18 + $0x10] sm:$0xff]  ;;  %v1699_v12 = vld [vmem:[%s228_s18 + $0x18] sm:$0xff]  ;;  %s1565_s30 = smov (!%p1251_p1), 127  }
  0x23   : > { %v1701_v13 = vld [vmem:[%s228_s18 + $0x20] sm:$0xff]  ;;  %v1703_v14 = vld [vmem:[%s228_s18 + $0x28] sm:$0xff]  ;;  %v1705_v15 = vld [vmem:[%s228_s18 + $0x30] sm:$0xff]  ;;  %264 = sbr.rel (%p1251_p1) target bundleno = 705 (0x2c1), region = 36 }
  0x24   : > { %v1707_v16 = vld [vmem:[%s228_s18 + $0x38] sm:$0xff] }
  0x28   : > { %v265_v17 = vlaneseq  ;;  %vm279_vm1 = vcmask 80896   ;;  %vm594_vm12 = vcmask 7168   ;;  %vm646_vm13 = vcmask 0  }
  0x2a   : > { %v1710_v18 = vand.u32 127, %v265_v17 }
  0x2c   : > { %vm267_vm2 = vcmp.lt.s32.totalorder %v1710_v18, 3  ;;  %vm268_vm11 = vcmp.ge.s32.totalorder %v1710_v18, 3 }
  0x2d   : > { %v271_v19 = vsel %vm267_vm2, %v1673_v1, -1e+30  ;;  %v273_v20 = vsel %vm267_vm2, %v1677_v3, -1e+30  ;;  %v272_v21 = vsel %vm267_vm2, %v1675_v2, -1e+30 }
  0x2e   : > { %v280_v22 = vsel %vm279_vm1, %v271_v19, -inf  ;;  %v286_v23 = vsel %vm279_vm1, %v273_v20, -inf  ;;  %v274_v24 = vsel %vm267_vm2, %v1683_v4, -1e+30  ;;  %v283_v25 = vsel %vm279_vm1, %v272_v21, -inf }
  0x2f   : > { %281 = vmax.xlane.f32.xlu0 %v280_v22  ;;  %287 = vmax.xlane.f32.xlu1 %v286_v23  ;;  %v289_v26 = vsel %vm279_vm1, %v274_v24, -inf  ;;  %v275_v27 = vsel %vm267_vm2, %v1685_v5, -1e+30  ;;  %v276_v28 = vsel %vm267_vm2, %v1687_v6, -1e+30  ;;  %v376_v35 = vsel %vm267_vm2, %v1693_v9, 0.0 }
  0x30   : > { %v292_v29 = vsel %vm279_vm1, %v275_v27, -inf  ;;  %v295_v30 = vsel %vm279_vm1, %v276_v28, -inf  ;;  %v277_v31 = vsel %vm267_vm2, %v1689_v7, -1e+30  ;;  %v278_v32 = vsel %vm267_vm2, %v1691_v8, -1e+30 }
  0x31   : > { %v298_v33 = vsel %vm279_vm1, %v277_v31, -inf  ;;  %v301_v34 = vsel %vm279_vm1, %v278_v32, -inf  ;;  %v384_v36 = vsel %vm279_vm1, %v376_v35, 0.0  ;;  %v377_v37 = vsel %vm267_vm2, %v1695_v10, 0.0 }
  0x32   : > { %v387_v38 = vsel %vm279_vm1, %v377_v37, 0.0  ;;  %v408_v39 = vmul.f32 %v376_v35, %v1673_v1  ;;  %v409_v40 = vmul.f32 %v377_v37, %v1675_v2  ;;  %v378_v43 = vsel %vm267_vm2, %v1697_v11, 0.0 }
  0x33   : > { %284 = vmax.xlane.f32.xlu0 %v283_v25  ;;  %290 = vmax.xlane.f32.xlu1 %v289_v26  ;;  %v390_v44 = vsel %vm279_vm1, %v378_v43, 0.0  ;;  %v410_v45 = vmul.f32 %v378_v43, %v1677_v3  ;;  %v379_v37 = vsel %vm267_vm2, %v1699_v12, 0.0  ;;  %v380_v43 = vsel %vm267_vm2, %v1701_v13, 0.0 }
  0x34   : > { %v416_v41 = vsel %vm279_vm1, %v408_v39, 0.0  ;;  %v419_v42 = vsel %vm279_vm1, %v409_v40, 0.0 }
  0x35   : > { %v422_v46 = vsel %vm279_vm1, %v410_v45, 0.0  ;;  %v396_v45 = vsel %vm279_vm1, %v380_v43, 0.0 }
  0x37   : > { %293 = vmax.xlane.f32.xlu0 %v292_v29  ;;  %296 = vmax.xlane.f32.xlu1 %v295_v30 }
  0x3b   : > { %299 = vmax.xlane.f32.xlu0 %v298_v33  ;;  %302 = vmax.xlane.f32.xlu1 %v301_v34 }
  0x3f   : > { %385 = vadd.xlane.f32.xlu0 %v384_v36  ;;  %388 = vadd.xlane.f32.xlu1 %v387_v38 }
  0x43   : > { %417 = vadd.xlane.f32.xlu0 %v416_v41  ;;  %420 = vadd.xlane.f32.xlu1 %v419_v42  ;;  %v393_v41 = vsel %vm279_vm1, %v379_v37, 0.0  ;;  %v411_v42 = vmul.f32 %v379_v37, %v1683_v4 }
  0x47   : > { %391 = vadd.xlane.f32.xlu0 %v390_v44  ;;  %423 = vadd.xlane.f32.xlu1 %v422_v46  ;;  %v425_v44 = vsel %vm279_vm1, %v411_v42, 0.0  ;;  %v412_v46 = vmul.f32 %v380_v43, %v1685_v5 }
  0xb8   : > { %v1763_v47 = vpop.xlane.xlu0 %281  ;;  %v1765_v48 = vpop.xlane.xlu1 %287 }
  0xb9   : > { %v304_v49 = vsub.f32 %v271_v19, %v1763_v47  ;;  %v306_v50 = vsub.f32 %v273_v20, %v1765_v48 }
  0xbb   : > { %v312_v51 = vmul.f32 1.442695, %v304_v49  ;;  %v316_v52 = vmul.f32 1.442695, %v306_v50  ;;  %v381_v49 = vsel %vm267_vm2, %v1703_v14, 0.0  ;;  %v428_v50 = vsel %vm279_vm1, %v412_v46, 0.0 }
  0xbc   : > { %v1769_v53 = vpop.xlane.xlu0 %284  ;;  %v1771_v54 = vpop.xlane.xlu1 %290 }
  0xbd   : > { %1341 = vpow2.f32 %v312_v51  ;;  %v305_v55 = vsub.f32 %v272_v21, %v1769_v53  ;;  %v307_v56 = vsub.f32 %v274_v24, %v1771_v54  ;;  %v399_v51 = vsel %vm279_vm1, %v381_v49, 0.0 }
  0xbe   : > { %1343 = vpow2.f32 %v316_v52  ;;  %v413_v52 = vmul.f32 %v381_v49, %v1687_v6 }
  0xbf   : > { %v314_v57 = vmul.f32 1.442695, %v305_v55  ;;  %v318_v58 = vmul.f32 1.442695, %v307_v56  ;;  %v382_v55 = vsel %vm267_vm2, %v1705_v15, 0.0 }
  0xc0   : > { %v1775_v59 = vpop.xlane.xlu0 %293  ;;  %v1777_v60 = vpop.xlane.xlu1 %296  ;;  %v431_v56 = vsel %vm279_vm1, %v413_v52, 0.0 }
  0xc1   : > { %1345 = vpow2.f32 %v314_v57  ;;  %v308_v61 = vsub.f32 %v275_v27, %v1775_v59  ;;  %v309_v62 = vsub.f32 %v276_v28, %v1777_v60  ;;  %v402_v57 = vsel %vm279_vm1, %v382_v55, 0.0 }
  0xc2   : > { %1347 = vpow2.f32 %v318_v58  ;;  %v414_v58 = vmul.f32 %v382_v55, %v1689_v7 }
  0xc3   : > { %v320_v63 = vmul.f32 1.442695, %v308_v61  ;;  %v322_v0 = vmul.f32 1.442695, %v309_v62  ;;  %v383_v61 = vsel %vm267_vm2, %v1707_v16, 0.0 }
  0xc4   : > { %v1781_v17 = vpop.xlane.xlu0 %299  ;;  %v1783_v19 = vpop.xlane.xlu1 %302  ;;  %v434_v62 = vsel %vm279_vm1, %v414_v58, 0.0 }
  0xc5   : > { %1349 = vpow2.f32 %v320_v63  ;;  %v310_v20 = vsub.f32 %v277_v31, %v1781_v17  ;;  %v311_v21 = vsub.f32 %v278_v32, %v1783_v19  ;;  %v405_v63 = vsel %vm279_vm1, %v383_v61, 0.0 }
  0xc6   : > { %1351 = vpow2.f32 %v322_v0  ;;  %v415_v0 = vmul.f32 %v383_v61, %v1691_v8 }
  0xc7   : > { %v324_v22 = vmul.f32 1.442695, %v310_v20  ;;  %v326_v23 = vmul.f32 1.442695, %v311_v21 }
  0xc8   : > { %v437_v20 = vsel %vm279_vm1, %v415_v0, 0.0  ;;  %v1825_v21 = vpop.xlane.xlu0 %385 }
  0xc9   : > { %1353 = vpow2.f32 %v324_v22  ;;  %v488_v22 = vand.u32 2147483647, %v1673_v1  ;;  %vm440_vm3 = vcmp.eq.f32.partialorder %v1825_v21, 0.0 }
  0xca   : > { %v1342_v24 = vpop.eup %1341  ;;  %1355 = vpow2.f32 %v326_v23  ;;  %v489_v23 = vand.u32 2147483647, %v1675_v2 }
  0xcb   : > { %v1344_v25 = vpop.eup %1343  ;;  %v328_v26 = vsel %vm279_vm1, %v1342_v24, 0.0  ;;  %v1829_v24 = vpop.xlane.xlu1 %388 }
  0xcc   : > { %329 = vadd.xlane.f32.xlu0 %v328_v26  ;;  %v334_v27 = vsel %vm279_vm1, %v1344_v25, 0.0  ;;  %v1831_v25 = vpop.xlane.xlu0 %417  ;;  %v496_v26 = vsub.f32 0.0, %v488_v22  ;;  %vm441_vm4 = vcmp.eq.f32.partialorder %v1829_v24, 0.0 }
  0xce   : > { %v1346_v28 = vpop.eup %1345 }
  0xcf   : > { %v1348_v29 = vpop.eup %1347  ;;  %v331_v30 = vsel %vm279_vm1, %v1346_v28, 0.0  ;;  %v497_v28 = vsub.f32 0.0, %v489_v23 }
  0xd0   : > { %335 = vadd.xlane.f32.xlu0 %v334_v27  ;;  %332 = vadd.xlane.f32.xlu1 %v331_v30  ;;  %v337_v31 = vsel %vm279_vm1, %v1348_v29, 0.0  ;;  %v490_v27 = vand.u32 2147483647, %v1677_v3  ;;  %v491_v29 = vand.u32 2147483647, %v1683_v4  ;;  %v1835_v30 = vpop.xlane.xlu1 %420 }
  0xd2   : > { %v1350_v32 = vpop.eup %1349 }
  0xd3   : > { %v1352_v33 = vpop.eup %1351  ;;  %v340_v34 = vsel %vm279_vm1, %v1350_v32, 0.0  ;;  %v504_v32 = vmul.f32 1.442695, %v496_v26 }
  0xd4   : > { %338 = vadd.xlane.f32.xlu1 %v337_v31  ;;  %341 = vadd.xlane.f32.xlu0 %v340_v34  ;;  %v343_v35 = vsel %vm279_vm1, %v1352_v33, 0.0  ;;  %v1837_v31 = vpop.xlane.xlu0 %391  ;;  %v498_v33 = vsub.f32 0.0, %v490_v27  ;;  %v506_v34 = vmul.f32 1.442695, %v497_v28  ;;  %v1840_v37 = vpop.xlane.xlu1 %423 }
  0xd5   : > { %1357 = vpow2.f32 %v504_v32  ;;  %vm442_vm5 = vcmp.eq.f32.partialorder %v1837_v31, 0.0 }
  0xd6   : > { %v1354_v36 = vpop.eup %1353  ;;  %1359 = vpow2.f32 %v506_v34 }
  0xd7   : > { %v1356_v38 = vpop.eup %1355  ;;  %v346_v39 = vsel %vm279_vm1, %v1354_v36, 0.0  ;;  %v499_v36 = vsub.f32 0.0, %v491_v29 }
  0xd8   : > { %344 = vadd.xlane.f32.xlu1 %v343_v35  ;;  %347 = vadd.xlane.f32.xlu0 %v346_v39  ;;  %v349_v40 = vsel %vm279_vm1, %v1356_v38, 0.0  ;;  %v492_v35 = vand.u32 2147483647, %v1685_v5  ;;  %v508_v38 = vmul.f32 1.442695, %v498_v33 }
  0xd9   : > { %v510_v42 = vmul.f32 1.442695, %v499_v36  ;;  %v448_v36 = vsel %vm440_vm3, %v1673_v1, %v1831_v25  ;;  %v449_v25 = vsel %vm441_vm4, %v1675_v2, %v1835_v30 }
  0xdc   : > { %350 = vadd.xlane.f32.xlu1 %v349_v40  ;;  %394 = vadd.xlane.f32.xlu0 %v393_v41  ;;  %v493_v40 = vand.u32 2147483647, %v1687_v6  ;;  %v500_v41 = vsub.f32 0.0, %v492_v35 }
  0xde   : > { %v501_v46 = vsub.f32 0.0, %v493_v40  ;;  %v512_v49 = vmul.f32 1.442695, %v500_v41 }
  0xe0   : > { %426 = vadd.xlane.f32.xlu1 %v425_v44  ;;  %397 = vadd.xlane.f32.xlu0 %v396_v45  ;;  %v494_v45 = vand.u32 2147483647, %v1689_v7  ;;  %v514_v55 = vmul.f32 1.442695, %v501_v46 }
  0xe2   : > { %v502_v52 = vsub.f32 0.0, %v494_v45 }
  0xe4   : > { %429 = vadd.xlane.f32.xlu1 %v428_v50  ;;  %400 = vadd.xlane.f32.xlu0 %v399_v51 }
  0xe8   : > { %432 = vadd.xlane.f32.xlu1 %v431_v56  ;;  %403 = vadd.xlane.f32.xlu0 %v402_v57  ;;  %v495_v56 = vand.u32 2147483647, %v1691_v8  ;;  %v1358_v57 = vpop.eup %1357 }
  0xe9   : > { %v1360_v58 = vpop.eup %1359  ;;  %v520_v22 = vadd.f32 1.0, %v1358_v57 }
  0xea   : > { %v503_v0 = vsub.f32 0.0, %v495_v56  ;;  %v521_v26 = vadd.f32 1.0, %v1360_v58 }
  0xec   : > { %435 = vadd.xlane.f32.xlu1 %v434_v62  ;;  %406 = vadd.xlane.f32.xlu0 %v405_v63  ;;  %v516_v63 = vmul.f32 1.442695, %v502_v52  ;;  %v518_v34 = vmul.f32 1.442695, %v503_v0 }
  0xf0   : > { %438 = vadd.xlane.f32.xlu1 %v437_v20 }
 0x155   : > { %v330_v39 = vpop.xlane.xlu0 %329 }
 0x156   : > { %1361 = vlog2.f32 %v330_v39 }
 0x157   : > { %1363 = vpow2.f32 %v508_v38 }
 0x158   : > { %1365 = vpow2.f32 %v510_v42 }
 0x159   : > { %v333_v43 = vpop.xlane.xlu1 %332  ;;  %v336_v44 = vpop.xlane.xlu0 %335 }
 0x15a   : > { %1367 = vlog2.f32 %v333_v43 }
 0x15b   : > { %1369 = vlog2.f32 %v336_v44 }
 0x15c   : > { %1371 = vpow2.f32 %v512_v49 }
 0x15d   : > { %v339_v50 = vpop.xlane.xlu1 %338  ;;  %v342_v51 = vpop.xlane.xlu0 %341 }
 0x15e   : > { %1373 = vlog2.f32 %v339_v50 }
 0x15f   : > { %1375 = vlog2.f32 %v342_v51 }
 0x160   : > { %1377 = vpow2.f32 %v514_v55 }
 0x161   : > { %v345_v61 = vpop.xlane.xlu1 %344  ;;  %v348_v62 = vpop.xlane.xlu0 %347 }
 0x162   : > { %1379 = vlog2.f32 %v345_v61  ;;  %v450_v61 = vsel %vm442_vm5, %v1677_v3, %v1840_v37  ;;  %v464_v37 = vmax.f32 %v1673_v1, 0.0 }
 0x163   : > { %v1362_v20 = vpop.eup %1361  ;;  %1381 = vlog2.f32 %v348_v62 }
 0x164   : > { %v353_v23 = vmul.f32 0.6931472, %v1362_v20  ;;  %v1364_v27 = vpop.eup %1363  ;;  %1383 = vpow2.f32 %v516_v63 }
 0x165   : > { %v351_v28 = vpop.xlane.xlu1 %350  ;;  %v395_v29 = vpop.xlane.xlu0 %394  ;;  %v522_v40 = vadd.f32 1.0, %v1364_v27 }
 0x166   : > { %v1366_v32 = vpop.eup %1365  ;;  %1385 = vlog2.f32 %v351_v28  ;;  %v368_v33 = vadd.f32 %v353_v23, %v1763_v47  ;;  %vm443_vm7 = vcmp.eq.f32.partialorder %v395_v29, 0.0 }
 0x167   : > { %v1368_v35 = vpop.eup %1367  ;;  %1387 = vlog2.f32 %v520_v22  ;;  %v523_v46 = vadd.f32 1.0, %v1366_v32 }
 0x168   : > { %v1370_v38 = vpop.eup %1369  ;;  %v355_v21 = vmul.f32 0.6931472, %v1368_v35  ;;  %v456_v39 = vsub.f32 %v368_v33, %v448_v36  ;;  %1389 = vlog2.f32 %v521_v26  ;;  %v465_v35 = vmax.f32 %v1675_v2, 0.0 }
 0x169   : > { %v357_v41 = vmul.f32 0.6931472, %v1370_v38  ;;  %v427_v42 = vpop.xlane.xlu1 %426  ;;  %v398_v43 = vpop.xlane.xlu0 %397  ;;  %1391 = vpow2.f32 %v518_v34  ;;  %v473_v36 = vmul.f32 %v1695_v10, %v1675_v2 }
 0x16a   : > { %v1372_v44 = vpop.eup %1371  ;;  %570 = vrot.lane.b32.xlu0 %v456_v39, %s1565_s30  ;;  %v369_v47 = vadd.f32 %v355_v21, %v1769_v53  ;;  %vm444_vm6 = vcmp.eq.f32.partialorder %v398_v43, 0.0  ;;  %1393 = vlog2.f32 %v522_v40 }
 0x16b   : > { %v1374_v45 = vpop.eup %1373  ;;  %v370_v52 = vadd.f32 %v357_v41, %v1765_v48  ;;  %v524_v24 = vadd.f32 1.0, %v1372_v44  ;;  %1395 = vlog2.f32 %v523_v46 }
 0x16c   : > { %v1376_v49 = vpop.eup %1375  ;;  %v359_v50 = vmul.f32 0.6931472, %v1374_v45  ;;  %v457_v51 = vsub.f32 %v369_v47, %v449_v25  ;;  %v474_v25 = vmul.f32 %v1697_v11, %v1677_v3 }
 0x16d   : > { %v361_v55 = vmul.f32 0.6931472, %v1376_v49  ;;  %v430_v56 = vpop.xlane.xlu1 %429  ;;  %v401_v53 = vpop.xlane.xlu0 %400  ;;  %v458_v20 = vsub.f32 %v370_v52, %v450_v61  ;;  %1397 = vlog2.f32 %v524_v24  ;;  %v467_v24 = vmax.f32 %v1683_v4, 0.0 }
 0x16e   : > { %v1378_v57 = vpop.eup %1377  ;;  %v452_v58 = vsel %vm444_vm6, %v1685_v5, %v430_v56  ;;  %572 = vrot.lane.b32.xlu1 %v457_v51, %s1565_s30  ;;  %v371_v0 = vadd.f32 %v359_v50, %v1771_v54  ;;  %vm445_vm8 = vcmp.eq.f32.partialorder %v401_v53, 0.0  ;;  %v472_v54 = vmul.f32 %v1693_v9, %v1673_v1 }
 0x16f   : > { %v1380_v30 = vpop.eup %1379  ;;  %v372_v62 = vadd.f32 %v361_v55, %v1775_v59  ;;  %v525_v32 = vadd.f32 1.0, %v1378_v57  ;;  %v451_v59 = vsel %vm443_vm7, %v1683_v4, %v427_v42  ;;  %v481_v50 = vsub.f32 %v465_v35, %v473_v36 }
 0x170   : > { %v1382_v48 = vpop.eup %1381  ;;  %v363_v63 = vmul.f32 0.6931472, %v1380_v30  ;;  %v459_v33 = vsub.f32 %v371_v0, %v451_v59  ;;  %v480_v46 = vsub.f32 %v464_v37, %v472_v54  ;;  %v475_v30 = vmul.f32 %v1699_v12, %v1683_v4 }
 0x171   : > { %v365_v22 = vmul.f32 0.6931472, %v1382_v48  ;;  %v460_v23 = vsub.f32 %v372_v62, %v452_v58  ;;  %v433_v26 = vpop.xlane.xlu1 %432  ;;  %v404_v27 = vpop.xlane.xlu0 %403  ;;  %1399 = vlog2.f32 %v525_v32  ;;  %v469_v59 = vmax.f32 %v1687_v6, 0.0 }
 0x172   : > { %v1384_v28 = vpop.eup %1383  ;;  %574 = vrot.lane.b32.xlu1 %v458_v20, %s1565_s30  ;;  %vm446_vm9 = vcmp.eq.f32.partialorder %v404_v27, 0.0  ;;  %v373_v34 = vadd.f32 %v363_v63, %v1777_v60  ;;  %v453_v39 = vsel %vm445_vm8, %v1687_v6, %v433_v26  ;;  %v466_v60 = vmax.f32 %v1677_v3, 0.0 }
 0x173   : > { %v1386_v31 = vpop.eup %1385  ;;  %578 = vrot.lane.b32.xlu0 %v460_v23, %s1565_s30  ;;  %v374_v41 = vadd.f32 %v365_v22, %v1781_v17  ;;  %v526_v44 = vadd.f32 1.0, %v1384_v28  ;;  %v468_v20 = vmax.f32 %v1685_v5, 0.0  ;;  %v476_v22 = vmul.f32 %v1701_v13, %v1685_v5 }
 0x174   : > { %v1388_v29 = vpop.eup %1387  ;;  %v367_v21 = vmul.f32 0.6931472, %v1386_v31  ;;  %v461_v49 = vsub.f32 %v373_v34, %v453_v39  ;;  %v482_v62 = vsub.f32 %v466_v60, %v474_v25  ;;  %v483_v23 = vsub.f32 %v467_v24, %v475_v30 }
 0x175   : > { %v1390_v38 = vpop.eup %1389  ;;  %v436_v40 = vpop.xlane.xlu1 %435  ;;  %v529_v51 = vmul.f32 0.6931472, %v1388_v29  ;;  %1401 = vlog2.f32 %v526_v44  ;;  %v477_v37 = vmul.f32 %v1703_v14, %v1687_v6  ;;  %v478_v39 = vmul.f32 %v1705_v15, %v1689_v7 }
 0x176   : > { %v407_v42 = vpop.xlane.xlu0 %406  ;;  %v454_v43 = vsel %vm446_vm9, %v1689_v7, %v436_v40  ;;  %576 = vrot.lane.b32.xlu1 %v459_v33, %s1565_s30  ;;  %v1392_v47 = vpop.eup %1391  ;;  %v531_v17 = vmul.f32 0.6931472, %v1390_v38  ;;  %v375_v55 = vadd.f32 %v367_v21, %v1783_v19  ;;  %v484_v33 = vsub.f32 %v468_v20, %v476_v22 }
 0x177   : > { %v462_v45 = vsub.f32 %v374_v41, %v454_v43  ;;  %vm447_vm10 = vcmp.eq.f32.partialorder %v407_v42, 0.0  ;;  %v1394_v52 = vpop.eup %1393  ;;  %v527_v57 = vadd.f32 1.0, %v1392_v47  ;;  %v544_v63 = vadd.f32 %v529_v51, %v480_v46 }
 0x178   : > { %v1396_v61 = vpop.eup %1395  ;;  %v533_v48 = vmul.f32 0.6931472, %v1394_v52  ;;  %v545_v19 = vadd.f32 %v531_v17, %v481_v50  ;;  %v470_v21 = vmax.f32 %v1689_v7, 0.0  ;;  %v485_v42 = vsub.f32 %v469_v59, %v477_v37 }
 0x179   : > { %v439_v56 = vpop.xlane.xlu1 %438  ;;  %582 = vrot.lane.b32.xlu0 %v462_v45, %s1565_s30  ;;  %1403 = vlog2.f32 %v527_v57  ;;  %v535_v26 = vmul.f32 0.6931472, %v1396_v61  ;;  %v554_v28 = vsel %vm268_vm11, %v544_v63, 0.0  ;;  %v471_v45 = vmax.f32 %v1691_v8, 0.0 }
 0x17a   : > { %v455_v53 = vsel %vm447_vm10, %v1691_v8, %v439_v56  ;;  %580 = vrot.lane.b32.xlu1 %v461_v49, %s1565_s30  ;;  %v1398_v0 = vpop.eup %1397  ;;  %v546_v27 = vadd.f32 %v533_v48, %v482_v62  ;;  %v555_v32 = vsel %vm268_vm11, %v545_v19, 0.0  ;;  %v619_v54 = vsel %vm279_vm1, %v554_v28, 0.0 }
 0x17b   : > { %v463_v58 = vsub.f32 %v375_v55, %v455_v53  ;;  %v620_v29 = vsel %vm279_vm1, %v555_v32, 0.0  ;;  %v537_v34 = vmul.f32 0.6931472, %v1398_v0  ;;  %v547_v35 = vadd.f32 %v535_v26, %v483_v23 }
 0x17c   : > { %v556_v36 = vsel %vm268_vm11, %v546_v27, 0.0  ;;  %v621_v38 = vadd.f32 %v620_v29, %v619_v54  ;;  %v479_v25 = vmul.f32 %v1707_v16, %v1691_v8  ;;  %v486_v50 = vsub.f32 %v470_v21, %v478_v39 }
 0x17d   : > { %v622_v40 = vsel %vm279_vm1, %v556_v36, 0.0  ;;  %v548_v60 = vadd.f32 %v537_v34, %v484_v33  ;;  %v557_v44 = vsel %vm268_vm11, %v547_v35, 0.0 }
 0x17e   : > { %584 = vrot.lane.b32.xlu1 %v463_v58, %s1565_s30  ;;  %v1400_v31 = vpop.eup %1399  ;;  %v623_v47 = vadd.f32 %v622_v40, %v621_v38  ;;  %v624_v46 = vsel %vm279_vm1, %v557_v44, 0.0  ;;  %v487_v53 = vsub.f32 %v471_v45, %v479_v25 }
 0x17f   : > { %v539_v43 = vmul.f32 0.6931472, %v1400_v31  ;;  %v558_v52 = vsel %vm268_vm11, %v548_v60, 0.0 }
 0x180   : > { %v625_v55 = vadd.f32 %v624_v46, %v623_v47  ;;  %v626_v56 = vsel %vm279_vm1, %v558_v52, 0.0 }
 0x181   : > { %v549_v17 = vadd.f32 %v539_v43, %v485_v42 }
 0x182   : > { %v1402_v41 = vpop.eup %1401  ;;  %v627_v30 = vadd.f32 %v626_v56, %v625_v55 }
 0x183   : > { %v541_v51 = vmul.f32 0.6931472, %v1402_v41  ;;  %v559_v24 = vsel %vm268_vm11, %v549_v17, 0.0 }
 0x184   : > { %v628_v61 = vsel %vm279_vm1, %v559_v24, 0.0  ;;  %v643_v24 = vld [vmem:[#allocation2] sm:$0x1] }
 0x185   : > { %v550_v58 = vadd.f32 %v541_v51, %v486_v50  ;;  %v629_v63 = vadd.f32 %v628_v61, %v627_v30  ;;  %v648_v30 = vld [vmem:[#allocation3] sm:$0x1] }
 0x186   : > { %v1404_v49 = vpop.eup %1403 }
 0x187   : > { %v543_v57 = vmul.f32 0.6931472, %v1404_v49  ;;  %v560_v48 = vsel %vm268_vm11, %v550_v58, 0.0 }
 0x188   : > { %v630_v19 = vsel %vm279_vm1, %v560_v48, 0.0 }
 0x189   : > { %v551_v62 = vadd.f32 %v543_v57, %v487_v53  ;;  %v631_v20 = vadd.f32 %v630_v19, %v629_v63 }
 0x18b   : > { %v561_v0 = vsel %vm268_vm11, %v551_v62, 0.0 }
 0x18c   : > { %v632_v22 = vsel %vm279_vm1, %v561_v0, 0.0 }
 0x18d   : > { %v633_v23 = vadd.f32 %v632_v22, %v631_v20 }
 0x1a2   : > { %634 = vadd.xlane.f32.xlu1 %v633_v23 }
 0x1dc   : > { %v571_v27 = vpop.permute.xlu0 %570 }
 0x1dd   : > { %v595_v31 = vsel %vm594_vm12, %v571_v27, 0.0 }
 0x1e0   : > { %v573_v26 = vpop.permute.xlu1 %572 }
 0x1e1   : > { %v596_v28 = vsel %vm594_vm12, %v573_v26, 0.0 }
 0x1e2   : > { %v597_v37 = vadd.f32 %v596_v28, %v595_v31 }
 0x1e4   : > { %v575_v32 = vpop.permute.xlu1 %574 }
 0x1e5   : > { %v598_v59 = vsel %vm594_vm12, %v575_v32, 0.0  ;;  %v579_v29 = vpop.permute.xlu0 %578 }
 0x1e6   : > { %v599_v54 = vadd.f32 %v598_v59, %v597_v37  ;;  %v602_v35 = vsel %vm594_vm12, %v579_v29, 0.0 }
 0x1e8   : > { %v577_v18 = vpop.permute.xlu1 %576 }
 0x1e9   : > { %v600_v33 = vsel %vm594_vm12, %v577_v18, 0.0 }
 0x1ea   : > { %v601_v34 = vadd.f32 %v600_v33, %v599_v54 }
 0x1eb   : > { %v583_v36 = vpop.permute.xlu0 %582 }
 0x1ec   : > { %v581_v38 = vpop.permute.xlu1 %580  ;;  %v603_v21 = vadd.f32 %v602_v35, %v601_v34  ;;  %v606_v41 = vsel %vm594_vm12, %v583_v36, 0.0 }
 0x1ed   : > { %v604_v39 = vsel %vm594_vm12, %v581_v38, 0.0 }
 0x1ee   : > { %v605_v40 = vadd.f32 %v604_v39, %v603_v21 }
 0x1f0   : > { %v585_v42 = vpop.permute.xlu1 %584  ;;  %v607_v43 = vadd.f32 %v606_v41, %v605_v40 }
 0x1f1   : > { %v608_v60 = vsel %vm594_vm12, %v585_v42, 0.0 }
 0x1f2   : > { %v609_v44 = vadd.f32 %v608_v60, %v607_v43 }
 0x1f4   : > { %610 = vadd.xlane.f32.xlu0 %v609_v44 }
 0x22b   : > { %v635_v47 = vpop.xlane.xlu1 %634 }
 0x22c   : > { %v636_v45 = vrot.slane %v635_v47, 4 }
 0x22e   : > { %v637_v25 = vadd.f32 %v636_v45, %v635_v47 }
 0x230   : > { %v638_v46 = vrot.slane %v637_v25, 2 }
 0x232   : > { %v639_v17 = vadd.f32 %v638_v46, %v637_v25 }
 0x234   : > { %v640_v56 = vrot.slane %v639_v17, 1 }
 0x236   : > { %v641_v58 = vadd.f32 %v640_v56, %v639_v17 }
 0x27d   : > { %v611_v49 = vpop.xlane.xlu0 %610 }
 0x27e   : > { %v612_v50 = vrot.slane %v611_v49, 4 }
 0x280   : > { %v613_v51 = vadd.f32 %v612_v50, %v611_v49 }
 0x282   : > { %v614_v52 = vrot.slane %v613_v51, 2 }
 0x284   : > { %v615_v55 = vadd.f32 %v614_v52, %v613_v51 }
 0x286   : > { %v616_v53 = vrot.slane %v615_v55, 1 }
 0x288   : > { %v617_v57 = vadd.f32 %v616_v53, %v615_v55 }
 0x28a   : > { %1258 = vpush %v617_v57 }
 0x28b   : > { %1260 = vpush %v641_v58 }
 0x2bb   : > { %s1259_s3 = spop %1258 }
 0x2bc   : > { %v644_v61 = vstv %s1259_s3  ;;  %s1261_s4 = spop %1260 }
 0x2bd   : > { %v645_v62 = vadd.f32 %v644_v61, %v643_v24  ;;  %v649_v48 = vstv %s1261_s4 }
 0x2be   : > { %v650_v63 = vadd.f32 %v649_v48, %v648_v30 }
 0x2bf   : > { %647 = vst.msk [vmem:[#allocation2] sm:$0x1] %vm646_vm13, %v645_v62 }
 0x2c0   : > { %651 = vst.msk [vmem:[#allocation3] sm:$0x1] %vm646_vm13, %v650_v63 }
 0x2c1 PF: > { %p1252_p2 = scmp.le.s32.totalorder %s1681_s27, 250 }
 0x2c2   : > { %s1566_s29 = smov (!%p1252_p2), 127  }
 0x2c3   : > { %655 = sbr.rel (%p1252_p2) target bundleno = 1381 (0x565), region = 40 }
 0x2c8   : > { %v656_v19 = vlaneseq  ;;  %v665_v0 = vstv %s1250_s24  ;;  %vm728_vm14 = vcmask 80896  }
 0x2ca   : > { %v657_v20 = vshrl.u32 %v656_v19, 7  ;;  %v1940_v22 = vand.u32 127, %v656_v19 }
 0x2cc   : > { %v1942_v23 = vadd.s32 %v665_v0, %v657_v20  ;;  %vm684_vm15 = vcmp.lt.s32.totalorder %v1940_v22, 3  ;;  %v659_v26 = vadd.s32 16, %v657_v20  ;;  %v658_v27 = vadd.s32 8, %v657_v20 }
 0x2cd   : > { %v660_v28 = vadd.s32 24, %v657_v20  ;;  %v661_v32 = vadd.s32 32, %v657_v20  ;;  %v662_v31 = vadd.s32 40, %v657_v20  ;;  %v663_v59 = vadd.s32 48, %v657_v20 }
 0x2ce   : > { %vm674_vm0 = vcmp.lt.s32.totalorder %v1942_v23, 250  ;;  %v1946_v37 = vadd.s32 %v665_v0, %v659_v26  ;;  %v1948_v54 = vadd.s32 %v665_v0, %v658_v27  ;;  %v664_v29 = vadd.s32 56, %v657_v20 }
 0x2cf   : > { %v1953_v18 = vsel %vm674_vm0, %v1673_v1, 0.0  ;;  %v1955_v33 = vadd.s32 %v665_v0, %v660_v28  ;;  %v1957_v34 = vadd.s32 %v665_v0, %v661_v32  ;;  %v1959_v35 = vadd.s32 %v665_v0, %v662_v31 }
 0x2d0   : > { %v1964_v36 = vsel %vm684_vm15, %v1953_v18, -1e+30  ;;  %vm676_vm1 = vcmp.lt.s32.totalorder %v1946_v37, 250  ;;  %vm675_vm2 = vcmp.lt.s32.totalorder %v1948_v54, 250  ;;  %v1968_v38 = vadd.s32 %v665_v0, %v663_v59 }
 0x2d1   : > { %v729_v1 = vsel %vm728_vm14, %v1964_v36, -inf  ;;  %v1975_v21 = vsel %vm676_vm1, %v1677_v3, 0.0  ;;  %v1980_v39 = vsel %vm675_vm2, %v1675_v2, 0.0  ;;  %vm677_vm3 = vcmp.lt.s32.totalorder %v1955_v33, 250 }
 0x2d2   : > { %730 = vmax.xlane.f32.xlu0 %v729_v1  ;;  %v1986_v40 = vsel %vm684_vm15, %v1975_v21, -1e+30  ;;  %v1991_v41 = vsel %vm684_vm15, %v1980_v39, -1e+30  ;;  %v1996_v3 = vsel %vm677_vm3, %v1683_v4, 0.0  ;;  %vm678_vm4 = vcmp.lt.s32.totalorder %v1957_v34, 250 }
 0x2d3   : > { %v735_v2 = vsel %vm728_vm14, %v1986_v40, -inf  ;;  %v732_v42 = vsel %vm728_vm14, %v1991_v41, -inf  ;;  %v2006_v43 = vsel %vm684_vm15, %v1996_v3, -1e+30  ;;  %v2011_v60 = vsel %vm678_vm4, %v1685_v5, 0.0 }
 0x2d4   : > { %736 = vmax.xlane.f32.xlu1 %v735_v2  ;;  %v2016_v4 = vsel %vm684_vm15, %v2011_v60, -1e+30  ;;  %vm679_vm5 = vcmp.lt.s32.totalorder %v1959_v35, 250  ;;  %vm680_vm6 = vcmp.lt.s32.totalorder %v1968_v38, 250  ;;  %v738_v44 = vsel %vm728_vm14, %v2006_v43, -inf }
 0x2d5   : > { %v2025_v47 = vsel %vm679_vm5, %v1687_v6, 0.0  ;;  %v2030_v5 = vsel %vm680_vm6, %v1689_v7, 0.0  ;;  %v2032_v45 = vadd.s32 %v665_v0, %v664_v29  ;;  %v741_v46 = vsel %vm728_vm14, %v2016_v4, -inf }
 0x2d6   : > { %733 = vmax.xlane.f32.xlu0 %v732_v42  ;;  %v2037_v25 = vsel %vm684_vm15, %v2025_v47, -1e+30  ;;  %v2045_v6 = vsel %vm684_vm15, %v2030_v5, -1e+30  ;;  %v711_v55 = vsel %vm675_vm2, %v1695_v10, 0.0  ;;  %v712_v48 = vsel %vm676_vm1, %v1697_v11, 0.0 }
 0x2d7   : > { %vm681_vm7 = vcmp.lt.s32.totalorder %v2032_v45, 250  ;;  %v744_v49 = vsel %vm728_vm14, %v2037_v25, -inf  ;;  %v747_v51 = vsel %vm728_vm14, %v2045_v6, -inf  ;;  %v826_v53 = vsel %vm684_vm15, %v711_v55, 0.0 }
 0x2d8   : > { %739 = vmax.xlane.f32.xlu1 %v738_v44  ;;  %v2050_v7 = vsel %vm681_vm7, %v1691_v8, 0.0  ;;  %v710_v8 = vsel %vm674_vm0, %v1693_v9, 0.0  ;;  %v836_v57 = vsel %vm728_vm14, %v826_v53, 0.0  ;;  %v858_v9 = vmul.f32 %v826_v53, %v1980_v39 }
 0x2d9   : > { %v2057_v50 = vsel %vm684_vm15, %v2050_v7, -1e+30  ;;  %v825_v52 = vsel %vm684_vm15, %v710_v8, 0.0  ;;  %v937_v24 = vand.u32 2147483647, %v1953_v18  ;;  %v827_v19 = vsel %vm684_vm15, %v712_v48, 0.0 }
 0x2da   : > { %742 = vmax.xlane.f32.xlu0 %v741_v46  ;;  %v750_v17 = vsel %vm728_vm14, %v2057_v50, -inf  ;;  %v833_v56 = vsel %vm728_vm14, %v825_v52, 0.0  ;;  %v857_v58 = vmul.f32 %v825_v52, %v1953_v18  ;;  %v868_v61 = vsel %vm728_vm14, %v858_v9, 0.0 }
 0x2db   : > { %v945_v10 = vsub.f32 0.0, %v937_v24  ;;  %v938_v62 = vand.u32 2147483647, %v1980_v39  ;;  %v839_v20 = vsel %vm728_vm14, %v827_v19, 0.0  ;;  %v859_v26 = vmul.f32 %v827_v19, %v1975_v21 }
 0x2dc   : > { %745 = vmax.xlane.f32.xlu1 %v744_v49  ;;  %v865_v30 = vsel %vm728_vm14, %v857_v58, 0.0  ;;  %v939_v28 = vand.u32 2147483647, %v1975_v21  ;;  %v940_v42 = vand.u32 2147483647, %v1996_v3  ;;  %v921_v52 = vmul.f32 %v710_v8, %v1953_v18 }
 0x2dd   : > { %v953_v63 = vmul.f32 1.442695, %v945_v10  ;;  %v946_v0 = vsub.f32 0.0, %v938_v62  ;;  %v871_v32 = vsel %vm728_vm14, %v859_v26, 0.0  ;;  %v922_v58 = vmul.f32 %v711_v55, %v1980_v39 }
 0x2de   : > { %748 = vmax.xlane.f32.xlu0 %v747_v51  ;;  %v947_v31 = vsub.f32 0.0, %v939_v28  ;;  %v948_v49 = vsub.f32 0.0, %v940_v42  ;;  %v941_v51 = vand.u32 2147483647, %v2011_v60  ;;  %vm685_vm8 = vcmp.ge.s32.totalorder %v1940_v22, 3 }
 0x2df   : > { %1405 = vpow2.f32 %v953_v63  ;;  %v955_v27 = vmul.f32 1.442695, %v946_v0  ;;  %v915_v8 = vmax.f32 %v1975_v21, 0.0  ;;  %v923_v19 = vmul.f32 %v712_v48, %v1975_v21 }
 0x2e0   : > { %751 = vmax.xlane.f32.xlu1 %v750_v17  ;;  %v957_v11 = vmul.f32 1.442695, %v947_v31  ;;  %v913_v17 = vmax.f32 %v1953_v18, 0.0  ;;  %v949_v53 = vsub.f32 0.0, %v941_v51  ;;  %v2118_v51 = vsel %vm677_vm3, %v1699_v12, 0.0 }
 0x2e1   : > { %1407 = vpow2.f32 %v955_v27  ;;  %v931_v27 = vsub.f32 %v915_v8, %v923_v19 }
 0x2e2   : > { %834 = vadd.xlane.f32.xlu0 %v833_v56  ;;  %1409 = vpow2.f32 %v957_v11  ;;  %v959_v56 = vmul.f32 1.442695, %v948_v49  ;;  %v961_v9 = vmul.f32 1.442695, %v949_v53  ;;  %v929_v24 = vsub.f32 %v913_v17, %v921_v52 }
 0x2e3   : > { %v916_v17 = vmax.f32 %v1996_v3, 0.0  ;;  %v924_v52 = vmul.f32 %v2118_v51, %v1996_v3  ;;  %v917_v53 = vmax.f32 %v2011_v60, 0.0 }
 0x2e4   : > { %837 = vadd.xlane.f32.xlu1 %v836_v57  ;;  %v914_v57 = vmax.f32 %v1980_v39, 0.0 }
 0x2e6   : > { %866 = vadd.xlane.f32.xlu0 %v865_v30  ;;  %v930_v10 = vsub.f32 %v914_v57, %v922_v58  ;;  %v932_v58 = vsub.f32 %v916_v17, %v924_v52 }
 0x2e8   : > { %869 = vadd.xlane.f32.xlu1 %v868_v61 }
 0x2ea   : > { %840 = vadd.xlane.f32.xlu0 %v839_v20 }
 0x2ec   : > { %872 = vadd.xlane.f32.xlu1 %v871_v32  ;;  %v1406_v59 = vpop.eup %1405 }
 0x2ed   : > { %v969_v29 = vadd.f32 1.0, %v1406_v59 }
 0x2ee   : > { %v1408_v1 = vpop.eup %1407 }
 0x2ef   : > { %1411 = vlog2.f32 %v969_v29  ;;  %v970_v2 = vadd.f32 1.0, %v1408_v1  ;;  %v1410_v44 = vpop.eup %1409 }
 0x2f0   : > { %v971_v46 = vadd.f32 1.0, %v1410_v44 }
 0x2f1   : > { %1413 = vlog2.f32 %v970_v2 }
 0x2f2   : > { %1415 = vlog2.f32 %v971_v46 }
 0x2f3   : > { %1417 = vpow2.f32 %v959_v56  ;;  %v2126_v56 = vsel %vm678_vm4, %v1701_v13, 0.0 }
 0x2f4   : > { %1419 = vpow2.f32 %v961_v9  ;;  %v925_v57 = vmul.f32 %v2126_v56, %v2011_v60 }
 0x2f6   : > { %v933_v12 = vsub.f32 %v917_v53, %v925_v57 }
 0x2fc   : > { %v1412_v30 = vpop.eup %1411 }
 0x2fd   : > { %v978_v61 = vmul.f32 0.6931472, %v1412_v30 }
 0x2fe   : > { %v1414_v62 = vpop.eup %1413 }
 0x2ff   : > { %v993_v63 = vadd.f32 %v978_v61, %v929_v24  ;;  %v980_v0 = vmul.f32 0.6931472, %v1414_v62  ;;  %v1416_v28 = vpop.eup %1415 }
 0x300   : > { %v982_v59 = vmul.f32 0.6931472, %v1416_v28  ;;  %v1418_v48 = vpop.eup %1417 }
 0x301   : > { %v1003_v20 = vsel %vm685_vm8, %v993_v63, 0.0  ;;  %v994_v26 = vadd.f32 %v980_v0, %v930_v10  ;;  %v972_v42 = vadd.f32 1.0, %v1418_v48  ;;  %v1420_v44 = vpop.eup %1419 }
 0x302   : > { %v1019_v55 = vsel %vm674_vm0, %v1003_v20, 0.0  ;;  %v995_v2 = vadd.f32 %v982_v59, %v931_v27  ;;  %v973_v49 = vadd.f32 1.0, %v1420_v44 }
 0x303   : > { %v1084_v32 = vsel %vm728_vm14, %v1019_v55, 0.0  ;;  %v1004_v31 = vsel %vm685_vm8, %v994_v26, 0.0  ;;  %1421 = vlog2.f32 %v972_v42 }
 0x304   : > { %v1020_v11 = vsel %vm675_vm2, %v1004_v31, 0.0  ;;  %v2113_v46 = vsel %vm685_vm8, %v995_v2, 0.0  ;;  %1423 = vlog2.f32 %v973_v49 }
 0x305   : > { %v1085_v29 = vsel %vm728_vm14, %v1020_v11, 0.0 }
 0x306   : > { %v2109_v1 = vadd.f32 %v1085_v29, %v1084_v32 }
 0x310   : > { %v1422_v9 = vpop.eup %1421 }
 0x311   : > { %v984_v24 = vmul.f32 0.6931472, %v1422_v9  ;;  %v1424_v30 = vpop.eup %1423 }
 0x312   : > { %v986_v10 = vmul.f32 0.6931472, %v1424_v30 }
 0x313   : > { %v996_v61 = vadd.f32 %v984_v24, %v932_v58 }
 0x314   : > { %v997_v63 = vadd.f32 %v986_v10, %v933_v12 }
 0x315   : > { %v2133_v62 = vsel %vm685_vm8, %v996_v61, 0.0 }
 0x316   : > { %v2137_v13 = vsel %vm685_vm8, %v997_v63, 0.0  ;;  %v828_v63 = vsel %vm684_vm15, %v2118_v51, 0.0 }
 0x35b   : > { %v2139_v8 = vpop.xlane.xlu0 %730 }
 0x35c   : > { %v753_v19 = vsub.f32 %v1964_v36, %v2139_v8 }
 0x35d   : > { %v2143_v0 = vpop.xlane.xlu1 %736 }
 0x35e   : > { %v761_v20 = vmul.f32 1.442695, %v753_v19  ;;  %v755_v55 = vsub.f32 %v1986_v40, %v2143_v0 }
 0x35f   : > { %v2147_v26 = vpop.xlane.xlu0 %733 }
 0x360   : > { %1425 = vpow2.f32 %v761_v20  ;;  %v765_v27 = vmul.f32 1.442695, %v755_v55  ;;  %v754_v28 = vsub.f32 %v1991_v41, %v2147_v26 }
 0x361   : > { %v2151_v32 = vpop.xlane.xlu1 %739 }
 0x362   : > { %1427 = vpow2.f32 %v765_v27  ;;  %v763_v31 = vmul.f32 1.442695, %v754_v28  ;;  %v756_v36 = vsub.f32 %v2006_v43, %v2151_v32  ;;  %v842_v27 = vsel %vm728_vm14, %v828_v63, 0.0 }
 0x363   : > { %v2155_v11 = vpop.xlane.xlu0 %742  ;;  %v860_v28 = vmul.f32 %v828_v63, %v1996_v3 }
 0x364   : > { %1429 = vpow2.f32 %v763_v31  ;;  %v767_v59 = vmul.f32 1.442695, %v756_v36  ;;  %v757_v40 = vsub.f32 %v2016_v4, %v2155_v11  ;;  %v829_v31 = vsel %vm684_vm15, %v2126_v56, 0.0 }
 0x365   : > { %v2159_v48 = vpop.xlane.xlu1 %745  ;;  %v2190_v36 = vsel %vm679_vm5, %v1703_v14, 0.0  ;;  %v874_v51 = vsel %vm728_vm14, %v860_v28, 0.0  ;;  %v716_v56 = vsel %vm680_vm6, %v1705_v15, 0.0 }
 0x366   : > { %1431 = vpow2.f32 %v767_v59  ;;  %v769_v29 = vmul.f32 1.442695, %v757_v40  ;;  %v758_v41 = vsub.f32 %v2037_v25, %v2159_v48  ;;  %v845_v59 = vsel %vm728_vm14, %v829_v31, 0.0 }
 0x367   : > { %v2163_v2 = vpop.xlane.xlu0 %748  ;;  %v861_v40 = vmul.f32 %v829_v31, %v2011_v60 }
 0x368   : > { %1433 = vpow2.f32 %v769_v29  ;;  %v771_v42 = vmul.f32 1.442695, %v758_v41  ;;  %v759_v43 = vsub.f32 %v2045_v6, %v2163_v2  ;;  %v830_v29 = vsel %vm684_vm15, %v2190_v36, 0.0 }
 0x369   : > { %v2167_v44 = vpop.xlane.xlu1 %751  ;;  %v877_v14 = vsel %vm728_vm14, %v861_v40, 0.0  ;;  %v848_v41 = vsel %vm728_vm14, %v830_v29, 0.0 }
 0x36a   : > { %1435 = vpow2.f32 %v771_v42  ;;  %v773_v49 = vmul.f32 1.442695, %v759_v43  ;;  %v760_v4 = vsub.f32 %v2057_v50, %v2167_v44  ;;  %v862_v42 = vmul.f32 %v830_v29, %v2025_v47 }
 0x36b   : > { %v831_v43 = vsel %vm684_vm15, %v716_v56, 0.0 }
 0x36c   : > { %1437 = vpow2.f32 %v773_v49  ;;  %v775_v17 = vmul.f32 1.442695, %v760_v4  ;;  %v2209_v49 = vsel %vm681_vm7, %v1707_v16, 0.0  ;;  %v880_v15 = vsel %vm728_vm14, %v862_v42, 0.0 }
 0x36d   : > { %v1426_v52 = vpop.eup %1425  ;;  %v851_v4 = vsel %vm728_vm14, %v831_v43, 0.0 }
 0x36e   : > { %1439 = vpow2.f32 %v775_v17  ;;  %v777_v25 = vsel %vm728_vm14, %v1426_v52, 0.0  ;;  %v863_v17 = vmul.f32 %v831_v43, %v2030_v5  ;;  %v832_v52 = vsel %vm684_vm15, %v2209_v49, 0.0 }
 0x36f   : > { %v1428_v53 = vpop.eup %1427  ;;  %778 = vadd.xlane.f32.xlu0 %v777_v25  ;;  %v864_v16 = vmul.f32 %v832_v52, %v2050_v7 }
 0x370   : > { %v783_v57 = vsel %vm728_vm14, %v1428_v53, 0.0  ;;  %v883_v25 = vsel %vm728_vm14, %v863_v17, 0.0  ;;  %v854_v53 = vsel %vm728_vm14, %v832_v52, 0.0  ;;  %v919_v52 = vmax.f32 %v2030_v5, 0.0 }
 0x371   : > { %v1430_v58 = vpop.eup %1429 }
 0x372   : > { %v780_v6 = vsel %vm728_vm14, %v1430_v58, 0.0  ;;  %v942_v58 = vand.u32 2147483647, %v2025_v47 }
 0x373   : > { %v1432_v9 = vpop.eup %1431  ;;  %784 = vadd.xlane.f32.xlu0 %v783_v57  ;;  %781 = vadd.xlane.f32.xlu1 %v780_v6  ;;  %v886_v57 = vsel %vm728_vm14, %v864_v16, 0.0  ;;  %v943_v6 = vand.u32 2147483647, %v2030_v5 }
 0x374   : > { %v786_v24 = vsel %vm728_vm14, %v1432_v9, 0.0  ;;  %v950_v9 = vsub.f32 0.0, %v942_v58  ;;  %v1021_v58 = vsel %vm676_vm1, %v2113_v46, 0.0 }
 0x375   : > { %v1434_v12 = vpop.eup %1433 }
 0x376   : > { %v789_v50 = vsel %vm728_vm14, %v1434_v12, 0.0  ;;  %v963_v12 = vmul.f32 1.442695, %v950_v9 }
 0x377   : > { %v1436_v30 = vpop.eup %1435  ;;  %787 = vadd.xlane.f32.xlu1 %v786_v24  ;;  %790 = vadd.xlane.f32.xlu0 %v789_v50  ;;  %v951_v24 = vsub.f32 0.0, %v943_v6 }
 0x378   : > { %v792_v61 = vsel %vm728_vm14, %v1436_v30, 0.0  ;;  %1441 = vpow2.f32 %v963_v12  ;;  %v835_v30 = vpop.xlane.xlu0 %834  ;;  %v1087_v12 = vsel %vm728_vm14, %v1021_v58, 0.0 }
 0x379   : > { %v1438_v10 = vpop.eup %1437  ;;  %v965_v50 = vmul.f32 1.442695, %v951_v24  ;;  %v920_v24 = vmax.f32 %v2050_v7, 0.0  ;;  %vm889_vm9 = vcmp.eq.f32.partialorder %v835_v30, 0.0  ;;  %v1023_v30 = vsel %vm678_vm4, %v2137_v13, 0.0 }
 0x37a   : > { %v795_v19 = vsel %vm728_vm14, %v1438_v10, 0.0 }
 0x37b   : > { %v1440_v20 = vpop.eup %1439  ;;  %793 = vadd.xlane.f32.xlu1 %v792_v61  ;;  %796 = vadd.xlane.f32.xlu0 %v795_v19  ;;  %1443 = vpow2.f32 %v965_v50  ;;  %v944_v61 = vand.u32 2147483647, %v2050_v7 }
 0x37c   : > { %v798_v55 = vsel %vm728_vm14, %v1440_v20, 0.0  ;;  %v2224_v20 = vpop.xlane.xlu1 %837 }
 0x37d   : > { %v952_v10 = vsub.f32 0.0, %v944_v61  ;;  %vm890_vm10 = vcmp.eq.f32.partialorder %v2224_v20, 0.0 }
 0x37f   : > { %799 = vadd.xlane.f32.xlu1 %v798_v55  ;;  %843 = vadd.xlane.f32.xlu0 %v842_v27  ;;  %v967_v63 = vmul.f32 1.442695, %v952_v10  ;;  %v867_v55 = vpop.xlane.xlu0 %866 }
 0x381   : > { %1445 = vpow2.f32 %v967_v63  ;;  %v1022_v63 = vsel %vm677_vm3, %v2133_v62, 0.0 }
 0x383   : > { %875 = vadd.xlane.f32.xlu1 %v874_v51  ;;  %846 = vadd.xlane.f32.xlu0 %v845_v59  ;;  %v870_v51 = vpop.xlane.xlu1 %869  ;;  %v2226_v59 = vpop.xlane.xlu0 %840 }
 0x384   : > { %vm891_vm11 = vcmp.eq.f32.partialorder %v2226_v59, 0.0 }
 0x385   : > { %v1442_v19 = vpop.eup %1441 }
 0x386   : > { %v974_v28 = vadd.f32 1.0, %v1442_v19 }
 0x387   : > { %878 = vadd.xlane.f32.xlu1 %v877_v14  ;;  %849 = vadd.xlane.f32.xlu0 %v848_v41  ;;  %v2228_v40 = vpop.xlane.xlu1 %872 }
 0x388   : > { %v1444_v27 = vpop.eup %1443  ;;  %1447 = vlog2.f32 %v974_v28 }
 0x389   : > { %v975_v31 = vadd.f32 1.0, %v1444_v27 }
 0x38b   : > { %881 = vadd.xlane.f32.xlu1 %v880_v15  ;;  %852 = vadd.xlane.f32.xlu0 %v851_v4  ;;  %1449 = vlog2.f32 %v975_v31  ;;  %v918_v15 = vmax.f32 %v2025_v47, 0.0  ;;  %v926_v4 = vmul.f32 %v2190_v36, %v2025_v47  ;;  %v928_v36 = vmul.f32 %v2209_v49, %v2050_v7 }
 0x38c   : > { %v1088_v31 = vadd.f32 %v1087_v12, %v2109_v1 }
 0x38d   : > { %v934_v6 = vsub.f32 %v918_v15, %v926_v4  ;;  %v936_v27 = vsub.f32 %v920_v24, %v928_v36  ;;  %v899_v24 = vsel %vm891_vm11, %v1975_v21, %v2228_v40 }
 0x38e   : > { %v1446_v14 = vpop.eup %1445 }
 0x38f   : > { %884 = vadd.xlane.f32.xlu1 %v883_v25  ;;  %855 = vadd.xlane.f32.xlu0 %v854_v53  ;;  %v976_v41 = vadd.f32 1.0, %v1446_v14  ;;  %v927_v25 = vmul.f32 %v716_v56, %v2030_v5 }
 0x391   : > { %v935_v50 = vsub.f32 %v919_v52, %v927_v25  ;;  %v898_v52 = vsel %vm890_vm10, %v1980_v39, %v870_v51 }
 0x393   : > { %887 = vadd.xlane.f32.xlu1 %v886_v57 }
 0x395   : > { %v1448_v17 = vpop.eup %1447 }
 0x396   : > { %v988_v9 = vmul.f32 0.6931472, %v1448_v17 }
 0x398   : > { %v1450_v57 = vpop.eup %1449  ;;  %v998_v19 = vadd.f32 %v988_v9, %v934_v6 }
 0x399   : > { %v990_v56 = vmul.f32 0.6931472, %v1450_v57 }
 0x39a   : > { %v1008_v4 = vsel %vm685_vm8, %v998_v19, 0.0 }
 0x39b   : > { %v999_v49 = vadd.f32 %v990_v56, %v935_v50 }
 0x39d   : > { %v1009_v6 = vsel %vm685_vm8, %v999_v49, 0.0 }
 0x39e   : > { %v1025_v50 = vsel %vm680_vm6, %v1009_v6, 0.0 }
 0x39f   : > { %v1095_v22 = vsel %vm728_vm14, %v1025_v50, 0.0 }
 0x3f8   : > { %v779_v29 = vpop.xlane.xlu0 %778 }
 0x3f9   : > { %1451 = vlog2.f32 %v779_v29  ;;  %v897_v29 = vsel %vm889_vm9, %v1953_v18, %v867_v55  ;;  %v1091_v55 = vsel %vm728_vm14, %v1023_v30, 0.0 }
 0x3fa   : > { %1453 = vlog2.f32 %v976_v41 }
 0x3fc   : > { %v782_v42 = vpop.xlane.xlu1 %781  ;;  %v785_v43 = vpop.xlane.xlu0 %784 }
 0x3fd   : > { %1455 = vlog2.f32 %v782_v42  ;;  %v1089_v42 = vsel %vm728_vm14, %v1022_v63, 0.0 }
 0x3fe   : > { %1457 = vlog2.f32 %v785_v43  ;;  %v1090_v18 = vadd.f32 %v1089_v42, %v1088_v31 }
 0x400   : > { %v788_v53 = vpop.xlane.xlu1 %787  ;;  %v791_v16 = vpop.xlane.xlu0 %790  ;;  %v1092_v9 = vadd.f32 %v1091_v55, %v1090_v18 }
 0x401   : > { %1459 = vlog2.f32 %v788_v53 }
 0x402   : > { %1461 = vlog2.f32 %v791_v16 }
 0x404   : > { %v794_v61 = vpop.xlane.xlu1 %793  ;;  %v797_v10 = vpop.xlane.xlu0 %796 }
 0x405   : > { %1463 = vlog2.f32 %v794_v61 }
 0x406   : > { %v1452_v46 = vpop.eup %1451  ;;  %1465 = vlog2.f32 %v797_v10 }
 0x407   : > { %v802_v28 = vmul.f32 0.6931472, %v1452_v46  ;;  %v1454_v43 = vpop.eup %1453 }
 0x408   : > { %v800_v14 = vpop.xlane.xlu1 %799  ;;  %v844_v41 = vpop.xlane.xlu0 %843  ;;  %v992_v15 = vmul.f32 0.6931472, %v1454_v43 }
 0x409   : > { %1467 = vlog2.f32 %v800_v14  ;;  %v817_v62 = vadd.f32 %v802_v28, %v2139_v8  ;;  %v1024_v8 = vsel %vm679_vm5, %v1008_v4, 0.0  ;;  %vm892_vm13 = vcmp.eq.f32.partialorder %v844_v41, 0.0 }
 0x40a   : > { %v1456_v1 = vpop.eup %1455  ;;  %v1000_v58 = vadd.f32 %v992_v15, %v936_v27  ;;  %v1093_v21 = vsel %vm728_vm14, %v1024_v8, 0.0 }
 0x40b   : > { %v1458_v17 = vpop.eup %1457  ;;  %v804_v25 = vmul.f32 0.6931472, %v1456_v1  ;;  %v905_v53 = vsub.f32 %v817_v62, %v897_v29  ;;  %v1094_v56 = vadd.f32 %v1093_v21, %v1092_v9 }
 0x40c   : > { %v806_v16 = vmul.f32 0.6931472, %v1458_v17  ;;  %v876_v13 = vpop.xlane.xlu1 %875  ;;  %v847_v57 = vpop.xlane.xlu0 %846  ;;  %v1010_v12 = vsel %vm685_vm8, %v1000_v58, 0.0 }
 0x40d   : > { %v1011_v39 = vsel %vm674_vm0, %v905_v53, 0.0  ;;  %vm893_vm12 = vcmp.eq.f32.partialorder %v847_v57, 0.0  ;;  %v818_v20 = vadd.f32 %v804_v25, %v2147_v26  ;;  %v1026_v26 = vsel %vm681_vm7, %v1010_v12, 0.0 }
 0x40e   : > { %v1460_v51 = vpop.eup %1459  ;;  %1035 = vrot.lane.b32.xlu0 %v1011_v39, %s1566_s29  ;;  %v819_v36 = vadd.f32 %v806_v16, %v2143_v0  ;;  %v1097_v28 = vsel %vm728_vm14, %v1026_v26, 0.0  ;;  %v1096_v29 = vadd.f32 %v1095_v22, %v1094_v56 }
 0x40f   : > { %v1462_v59 = vpop.eup %1461  ;;  %v808_v23 = vmul.f32 0.6931472, %v1460_v51  ;;  %v906_v40 = vsub.f32 %v818_v20, %v898_v52 }
 0x410   : > { %v810_v61 = vmul.f32 0.6931472, %v1462_v59  ;;  %v879_v10 = vpop.xlane.xlu1 %878  ;;  %v850_v63 = vpop.xlane.xlu0 %849  ;;  %v907_v0 = vsub.f32 %v819_v36, %v899_v24  ;;  %v1098_v54 = vadd.f32 %v1097_v28, %v1096_v29 }
 0x411   : > { %v820_v46 = vadd.f32 %v808_v23, %v2151_v32  ;;  %v901_v19 = vsel %vm893_vm12, %v2011_v60, %v879_v10  ;;  %v1012_v27 = vsel %vm675_vm2, %v906_v40, 0.0  ;;  %vm894_vm15 = vcmp.eq.f32.partialorder %v850_v63, 0.0 }
 0x412   : > { %v1464_v31 = vpop.eup %1463  ;;  %v821_v49 = vadd.f32 %v810_v61, %v2155_v11  ;;  %1037 = vrot.lane.b32.xlu1 %v1012_v27, %s1566_s29  ;;  %v900_v32 = vsel %vm892_vm13, %v1996_v3, %v876_v13  ;;  %v1013_v11 = vsel %vm676_vm1, %v907_v0, 0.0  ;;  %vm1059_vm1 = vcmask 7168  }
 0x413   : > { %v1466_v14 = vpop.eup %1465  ;;  %v812_v42 = vmul.f32 0.6931472, %v1464_v31  ;;  %v908_v1 = vsub.f32 %v820_v46, %v900_v32  ;;  %v1113_v32 = vld [vmem:[#allocation3] sm:$0x1]  ;;  %vm1111_vm2 = vcmask 0  }
 0x414   : > { %v814_v43 = vmul.f32 0.6931472, %v1466_v14  ;;  %v909_v62 = vsub.f32 %v821_v49, %v901_v19  ;;  %v882_v60 = vpop.xlane.xlu1 %881  ;;  %v853_v30 = vpop.xlane.xlu0 %852 }
 0x415   : > { %v822_v15 = vadd.f32 %v812_v42, %v2159_v48  ;;  %v902_v18 = vsel %vm894_vm15, %v2025_v47, %v882_v60  ;;  %vm895_vm14 = vcmp.eq.f32.partialorder %v853_v30, 0.0  ;;  %v1014_v25 = vsel %vm677_vm3, %v908_v1, 0.0 }
 0x416   : > { %v1468_v4 = vpop.eup %1467  ;;  %1039 = vrot.lane.b32.xlu1 %v1013_v11, %s1566_s29  ;;  %v1015_v55 = vsel %vm678_vm4, %v909_v62, 0.0  ;;  %v823_v17 = vadd.f32 %v814_v43, %v2163_v2  ;;  %v1108_v43 = vld [vmem:[#allocation2] sm:$0x1] }
 0x417   : > { %1043 = vrot.lane.b32.xlu0 %v1015_v55, %s1566_s29  ;;  %v816_v3 = vmul.f32 0.6931472, %v1468_v4  ;;  %v910_v48 = vsub.f32 %v822_v15, %v902_v18 }
 0x418   : > { %v885_v41 = vpop.xlane.xlu1 %884  ;;  %v856_v52 = vpop.xlane.xlu0 %855 }
 0x419   : > { %v903_v37 = vsel %vm895_vm14, %v2030_v5, %v885_v41  ;;  %vm896_vm0 = vcmp.eq.f32.partialorder %v856_v52, 0.0  ;;  %v824_v34 = vadd.f32 %v816_v3, %v2167_v44  ;;  %v1016_v5 = vsel %vm679_vm5, %v910_v48, 0.0 }
 0x41a   : > { %v911_v47 = vsub.f32 %v823_v17, %v903_v37  ;;  %1041 = vrot.lane.b32.xlu1 %v1014_v25, %s1566_s29 }
 0x41c   : > { %v888_v53 = vpop.xlane.xlu1 %887  ;;  %v1017_v8 = vsel %vm680_vm6, %v911_v47, 0.0 }
 0x41d   : > { %v904_v16 = vsel %vm896_vm0, %v2050_v7, %v888_v53  ;;  %1047 = vrot.lane.b32.xlu0 %v1017_v8, %s1566_s29 }
 0x41e   : > { %v912_v2 = vsub.f32 %v824_v34, %v904_v16  ;;  %1045 = vrot.lane.b32.xlu1 %v1016_v5, %s1566_s29 }
 0x420   : > { %v1018_v33 = vsel %vm681_vm7, %v912_v2, 0.0 }
 0x422   : > { %1049 = vrot.lane.b32.xlu1 %v1018_v33, %s1566_s29 }
 0x446   : > { %1099 = vadd.xlane.f32.xlu1 %v1098_v54 }
 0x480   : > { %v1036_v38 = vpop.permute.xlu0 %1035 }
 0x481   : > { %v1060_v57 = vsel %vm1059_vm1, %v1036_v38, 0.0 }
 0x484   : > { %v1038_v44 = vpop.permute.xlu1 %1037 }
 0x485   : > { %v1061_v13 = vsel %vm1059_vm1, %v1038_v44, 0.0 }
 0x486   : > { %v1062_v58 = vadd.f32 %v1061_v13, %v1060_v57 }
 0x488   : > { %v1040_v7 = vpop.permute.xlu1 %1039 }
 0x489   : > { %v1063_v35 = vsel %vm1059_vm1, %v1040_v7, 0.0  ;;  %v1044_v9 = vpop.permute.xlu0 %1043 }
 0x48a   : > { %v1064_v6 = vadd.f32 %v1063_v35, %v1062_v58  ;;  %v1067_v20 = vsel %vm1059_vm1, %v1044_v9, 0.0 }
 0x48c   : > { %v1042_v24 = vpop.permute.xlu1 %1041 }
 0x48d   : > { %v1065_v45 = vsel %vm1059_vm1, %v1042_v24, 0.0 }
 0x48e   : > { %v1066_v39 = vadd.f32 %v1065_v45, %v1064_v6 }
 0x48f   : > { %v1048_v51 = vpop.permute.xlu0 %1047 }
 0x490   : > { %v1046_v36 = vpop.permute.xlu1 %1045  ;;  %v1068_v12 = vadd.f32 %v1067_v20, %v1066_v39  ;;  %v1071_v59 = vsel %vm1059_vm1, %v1048_v51, 0.0 }
 0x491   : > { %v1069_v50 = vsel %vm1059_vm1, %v1046_v36, 0.0 }
 0x492   : > { %v1070_v21 = vadd.f32 %v1069_v50, %v1068_v12 }
 0x494   : > { %v1050_v23 = vpop.permute.xlu1 %1049  ;;  %v1072_v40 = vadd.f32 %v1071_v59, %v1070_v21 }
 0x495   : > { %v1073_v26 = vsel %vm1059_vm1, %v1050_v23, 0.0 }
 0x496   : > { %v1074_v56 = vadd.f32 %v1073_v26, %v1072_v40 }
 0x498   : > { %1075 = vadd.xlane.f32.xlu0 %v1074_v56 }
 0x4cf   : > { %v1100_v61 = vpop.xlane.xlu1 %1099 }
 0x4d0   : > { %v1101_v10 = vrot.slane %v1100_v61, 4 }
 0x4d2   : > { %v1102_v63 = vadd.f32 %v1101_v10, %v1100_v61 }
 0x4d4   : > { %v1103_v0 = vrot.slane %v1102_v63, 2 }
 0x4d6   : > { %v1104_v27 = vadd.f32 %v1103_v0, %v1102_v63 }
 0x4d8   : > { %v1105_v49 = vrot.slane %v1104_v27, 1 }
 0x4da   : > { %v1106_v42 = vadd.f32 %v1105_v49, %v1104_v27 }
 0x521   : > { %v1076_v22 = vpop.xlane.xlu0 %1075 }
 0x522   : > { %v1077_v46 = vrot.slane %v1076_v22, 4 }
 0x524   : > { %v1078_v19 = vadd.f32 %v1077_v46, %v1076_v22 }
 0x526   : > { %v1079_v28 = vrot.slane %v1078_v19, 2 }
 0x528   : > { %v1080_v31 = vadd.f32 %v1079_v28, %v1078_v19 }
 0x52a   : > { %v1081_v29 = vrot.slane %v1080_v31, 1 }
 0x52c   : > { %v1082_v14 = vadd.f32 %v1081_v29, %v1080_v31 }
 0x52e   : > { %1262 = vpush %v1082_v14 }
 0x52f   : > { %1264 = vpush %v1106_v42 }
 0x55f   : > { %s1263_s5 = spop %1262 }
 0x560   : > { %v1109_v62 = vstv %s1263_s5  ;;  %s1265_s6 = spop %1264 }
 0x561   : > { %v1110_v60 = vadd.f32 %v1109_v62, %v1108_v43  ;;  %v1114_v30 = vstv %s1265_s6 }
 0x562   : > { %v1115_v54 = vadd.f32 %v1114_v30, %v1113_v32 }
 0x563   : > { %1112 = vst.msk [vmem:[#allocation2] sm:$0x1] %vm1111_vm2, %v1110_v60 }
 0x564   : > { %1116 = vst.msk [vmem:[#allocation3] sm:$0x1] %vm1111_vm2, %v1115_v54 }
 0x565 PF: > { %p1253_p4 = scmp.ne.s32.totalorder %s1546_s12, 1 }
 0x567   : > { %1120 = sbr.rel (%p1253_p4) target bundleno = 1521 (0x5f1), region = 44 }
 0x56c   : > { %v1121_v1 = vld [vmem:[#allocation2] sm:$0x1]  ;;  %v1123_v15 = vld [vmem:[#allocation3] sm:$0x1]  ;;  %v1127_v11 = vlaneseq  ;;  %v1567_v4 = vmov 0  }
 0x56d   : > { %1469 = vset.pattern.permute.xlu0 %v1567_v4  ;;  %v1122_v18 = vmul.f32 0.004, %v1121_v1  ;;  %v1124_v55 = vmul.f32 0.00057142857, %v1123_v15 }
 0x56e   : > { %v1128_v3 = vshrl.u32 %v1127_v11, 7 }
 0x56f   : > { %v1125_v41 = vadd.f32 %v1124_v55, %v1122_v18 }
 0x570   : > { %v1129_v17 = vsub.s32 0, %v1128_v3 }
 0x572   : > { %v1130_v52 = vrot.slane %v1125_v41, %v1129_v17 }
 0x574   : > { %1132 = vperm.xlu0 %1469, %v1130_v52  }
 0x5ef   : > { %v1133_v48 = vpop.permute.xlu0 %1132 }
 0x5f0   : > { %1135 = vst [vmem:[%s205_s23] sm:$0xff] %v1133_v48 }
 0x5f1 PF: > { %s1255_s12 = sshll.u32 %s1550_s13, 7  ;;  %s1150_s18 = sshll.u32 %s205_s23, 4  ;;  %s1151_s18 = int_to_ptr.vmem [resolvable:$true] %s1150_s18 }
 0x5f2   : > { %s1148_s17 = scalar_lea.hbm %s2376_s2, %s1255_s12  ;;  %s1137_s24 = scalar_lea.sflag [#allocation5], %s203_s26 }
 0x5f3   : > { %s1470_s27 = scalar_lea.vmem %s1151_s18, 128  ;;  %s1568_s30 = smov [#allocation4]  }
 0x5f4   : > { %p1471_p5 = scmp.ne.s32.totalorder %s1151_s18, %s1470_s27  ;;  %s1474_s3 = sshll.u32 %s1568_s30, 4  ;;  %s1475_s3 = int_to_ptr.vmem [resolvable:$false] %s1474_s3 }
 0x5f5   : > { %s1476_s4 = scalar_lea.vmem %s1475_s3, 256  ;;  %p1477_p8 = scmp.lt.s32.totalorder %s1151_s18, %s1475_s3 }
 0x5f6   : > { %p1472_p6 = pnand %p1471_p5, %p1633_p3  ;;  %p1478_p10 = scmp.lt.s32.totalorder %s1476_s4, %s1470_s27 }
 0x5f8   : > { %p1473_p7 = pneg %p1472_p6  ;;  %p1479_p11 = por %p1478_p10, %p1477_p8 }
 0x5fa   : > { %p1480_p12 = pnand %p1479_p11, %p1473_p7 }
 0x5fc   : > { %1483 = shalt.err (!%p1480_p12)
}
 0x5fd   : > { %s1484_s13 = scalar_lea.hbm %s1148_s17, 128  ;;  %s1488_s23 = scalar_lea.hbm %s2376_s2, 256 }
 0x5fe   : > { %p1485_p13 = scmp.ne.s32.totalorder %s1148_s17, %s1484_s13  ;;  %p1489_p2 = scmp.lt.s32.totalorder %s1148_s17, %s2376_s2 }
 0x5ff   : > { %p1490_p4 = scmp.lt.s32.totalorder %s1488_s23, %s1484_s13 }
 0x600   : > { %p1486_p0 = pnand %p1485_p13, %p1633_p3 }
 0x601   : > { %p1491_p5 = por %p1490_p4, %p1489_p2 }
 0x602   : > { %p1487_p1 = pneg %p1486_p0 }
 0x604   : > { %p1492_p6 = pnand %p1491_p5, %p1487_p1 }
 0x606   : > { %1495 = shalt.err (!%p1492_p6)
}
 0x607   : > { %1266 = dma.vmem_to_hbm [thread:$0]  (%p1633_p3), %s1151_s18, 128, %s1148_s17, %s1137_s24  }
 0x608 PF: > { %p1272_p7 = scmp.ge.s32.totalorder %s1562_s16, 2  ;;  %s1162_s6 = sand.u32 1, %s1534_s9  }
 0x609   : > { %s1163_s12 = scalar_lea.sflag [#allocation5], %s1162_s6 }
 0x60a   : > { %p1269_p8 = pnand %p1272_p7, %p1643_p9 }
 0x60c   : > { %p1270_p10 = pneg %p1269_p8 }
 0x60e   : > { %1529 = dma.done.wait (%p1270_p10), %s1163_s12, 128  }
 0x60f   : > { %1531 = vsyncadd (%p1270_p10), %s1163_s12, 4294967168  ;;  %s15_s16 = sadd.s32 1, %s1562_s16   ;;  %s2379_s9 = smov %s1538_s10 }
 0x610   : > { %p12_p11 = scmp.ge.s32.totalorder %s15_s16, 6   ;;  %s2380_s10 = smov %s1542_s11 }
 0x611   : > { %s2381_s11 = smov %s1651_s25  ;;  %s2382_s12 = smov %s1554_s14 }
 0x612   : > { %s2383_s13 = smov %s1558_s15  ;;  %s2384_s14 = smov %s2387_s19 }
 0x613   : > { %s2385_s15 = smov %s2391_s20  ;;  %14 = sbr.rel (!%p12_p11) target bundleno = 5 (0x5), region = 82 }
 0x618   :  { %1168 = vsyncpa [#allocation5], 1 }
 0x619   :  { %1170 = vsyncpa [#allocation5 + $0x1], 1 }

</bundles_post_ra>
